<compile_context>
chip_gen: v6e
topology: v6e:2x2x1
jax: 0.10.0
libtpu: 0.0.40
codegen_flags: <defaults>
</compile_context>

<pallas_src>
import jax
import jax.numpy as jnp
import numpy as np
from jax import lax
from jax.experimental import pallas as pl
from jax.experimental.pallas import tpu as pltpu


# --------------------------------------------------------------------------
# Kernels
# --------------------------------------------------------------------------
def _clientnet_kernel_fused(x_ref, w_ref, b_ref, o_ref):
    # Whole K contraction in one block: x [tm, K] . W[tn, K]^T -> [tm, tn].
    acc = lax.dot_general(
        x_ref[...], w_ref[...],
        dimension_numbers=(((1,), (1,)), ((), ())),
        preferred_element_type=jnp.float32)
    out = acc + b_ref[...].astype(jnp.float32)
    o_ref[...] = jnp.maximum(out, 0.0).astype(o_ref.dtype)


def _clientnet_kernel_ksplit(x_ref, w_ref, b_ref, o_ref, acc_ref):
    # Fallback for contractions too large to hold in VMEM: K grid axis with a
    # resident f32 accumulator.  First k-step writes the partial directly
    # (no zero-init + RMW), epilogue applies bias + ReLU + downcast.
    k = pl.program_id(2)
    partial = lax.dot_general(
        x_ref[...], w_ref[...],
        dimension_numbers=(((1,), (1,)), ((), ())),
        preferred_element_type=jnp.float32)

    @pl.when(k == 0)
    def _():
        acc_ref[...] = partial

    @pl.when(k > 0)
    def _():
        acc_ref[...] += partial

    @pl.when(k == pl.num_programs(2) - 1)
    def _():
        out = acc_ref[...] + b_ref[...].astype(jnp.float32)
        o_ref[...] = jnp.maximum(out, 0.0).astype(o_ref.dtype)


# --------------------------------------------------------------------------
# Tiling / preparation
# --------------------------------------------------------------------------
def _round_up(x, m):
    return (x + m - 1) // m * m


def _vmem_budget_bytes():
    """VMEM budget with headroom, sized against the actual chip generation."""
    try:
        cap = pltpu.get_tpu_info().vmem_capacity_bytes
    except Exception:
        cap = 64 * 1024 * 1024  # conservative (v7x) if query unavailable
    return min(int(cap * 0.7), 96 * 1024 * 1024)


def _choose_tiles(n_dim, itemsize, tm, out_itemsize):
    """Pick (tn, tk, split_k, vmem_limit).  Prefers collapsing K entirely."""
    budget = _vmem_budget_bytes()
    n128 = _round_up(n_dim, 128)

    def fits(tn, tk, split):
        f = (2 * (tm * tk + tn * tk) * itemsize      # double-buffered x, W
             + 2 * tm * tn * out_itemsize            # double-buffered output
             + 2 * tn * 4)                           # bias
        if split:
            f += tm * tn * 4                         # f32 accumulator scratch
        return f <= budget

    # Lane-dense tn; keep >= 2 blocks along N where possible so both v7x
    # TensorCores get work even when the batch yields a single M block.
    tn_cands = [t for t in (1024, 512, 256, 128)
                if t <= n128 and (2 * t <= n128 or t == 128)]
    if not tn_cands:
        tn_cands = [n128]

    # Preferred: whole contraction in one block (no accumulator, no k loop).
    for tn in tn_cands:
        if fits(tn, n128, split=False):
            return tn, n128, False, budget

    # Fallback: split K with an accumulator.
    for tn in tn_cands:
        for tk in (2048, 1024, 512, 256, 128):
            if tk <= n128 and fits(tn, tk, split=True):
                return tn, tk, True, budget

    return 128, 128, True, budget


def prepare_clientnet(weight, bias, *, compute_dtype=jnp.bfloat16,
                      out_dtype=jnp.float32, batch_hint=8):
    """Cast + pad the Linear parameters ONCE (outside the per-call hot path).

    weight: [n_dim, n_dim] in PyTorch [out_features, in_features] layout.
    bias:   [n_dim]
    """
    n_out, n_in = weight.shape
    assert n_out == n_in, "ClientNet uses a square Linear(n_dim, n_dim)"
    assert bias.shape == (n_in,)
    n_dim = n_in

    tm_cap = max(8, min(1024, _round_up(batch_hint, 8)))
    itemsize = jnp.dtype(compute_dtype).itemsize
    tn, tk, split_k, vmem_limit = _choose_tiles(
        n_dim, itemsize, tm_cap, jnp.dtype(out_dtype).itemsize)

    n_pad = _round_up(n_dim, tn)
    k_pad = _round_up(n_dim, tk)

    # Padded rows/cols contribute exactly 0 and are sliced off after the call.
    wp = jnp.pad(weight.astype(compute_dtype),
                 ((0, n_pad - n_dim), (0, k_pad - n_dim)))
    bp = jnp.pad(bias.astype(jnp.float32), (0, n_pad - n_dim)).reshape(1, n_pad)

    return dict(wp=wp, bp=bp, n_dim=n_dim, tn=tn, tk=tk, split_k=split_k,
                tm_cap=tm_cap, compute_dtype=compute_dtype,
                out_dtype=out_dtype, vmem_limit_bytes=vmem_limit)


# --------------------------------------------------------------------------
# Forward
# --------------------------------------------------------------------------
def clientnet_forward(x, params):
    """relu(torch.flatten(x, 1) @ weight.T + bias) using prepared params."""
    wp, bp = params["wp"], params["bp"]
    n_dim = params["n_dim"]
    tn, tk = params["tn"], params["tk"]
    split_k = params["split_k"]
    cdtype = params["compute_dtype"]
    out_dtype = params["out_dtype"]
    vmem_limit = params["vmem_limit_bytes"]

    B = x.shape[0]
    x2d = jnp.reshape(x, (B, -1))                    # == torch.flatten(x, 1)
    assert x2d.shape[1] == n_dim

    n_pad, k_pad = wp.shape
    tm = min(params["tm_cap"], _round_up(B, 8))
    m_pad = _round_up(B, tm)

    # Only the (small) activation is cast/padded per call.
    xp = jnp.pad(x2d.astype(cdtype), ((0, m_pad - B), (0, k_pad - n_dim)))

    grid_m, grid_n = m_pad // tm, n_pad // tn
    itemsize = jnp.dtype(cdtype).itemsize
    out_itemsize = jnp.dtype(out_dtype).itemsize
    cost = pl.CostEstimate(
        flops=2 * m_pad * n_pad * k_pad,
        bytes_accessed=(grid_m * n_pad * k_pad * itemsize   # W re-streamed per M block
                        + grid_n * m_pad * k_pad * itemsize # x re-streamed per N block
                        + grid_m * n_pad * 4                # bias
                        + m_pad * n_pad * out_itemsize),    # output
        transcendentals=0)

    if not split_k:
        out = pl.pallas_call(
            _clientnet_kernel_fused,
            out_shape=jax.ShapeDtypeStruct((m_pad, n_pad), out_dtype),
            grid_spec=pltpu.PrefetchScalarGridSpec(
                num_scalar_prefetch=0,
                grid=(grid_m, grid_n),
                in_specs=[
                    pl.BlockSpec((tm, k_pad), lambda i, j: (i, 0)),  # x
                    pl.BlockSpec((tn, k_pad), lambda i, j: (j, 0)),  # W [out, in]
                    pl.BlockSpec((1, tn), lambda i, j: (0, j)),      # bias
                ],
                out_specs=pl.BlockSpec((tm, tn), lambda i, j: (i, j)),
            ),
            compiler_params=pltpu.CompilerParams(
                dimension_semantics=("parallel", "parallel"),
                vmem_limit_bytes=vmem_limit),
            cost_estimate=cost,
        )(xp, wp, bp)
    else:
        grid_k = k_pad // tk
        out = pl.pallas_call(
            _clientnet_kernel_ksplit,
            out_shape=jax.ShapeDtypeStruct((m_pad, n_pad), out_dtype),
            grid_spec=pltpu.PrefetchScalarGridSpec(
                num_scalar_prefetch=0,
                grid=(grid_m, grid_n, grid_k),
                in_specs=[
                    pl.BlockSpec((tm, tk), lambda i, j, k: (i, k)),  # x
                    pl.BlockSpec((tn, tk), lambda i, j, k: (j, k)),  # W [out, in]
                    pl.BlockSpec((1, tn), lambda i, j, k: (0, j)),   # bias
                ],
                out_specs=pl.BlockSpec((tm, tn), lambda i, j, k: (i, j)),
                scratch_shapes=[pltpu.VMEM((tm, tn), jnp.float32)],
            ),
            compiler_params=pltpu.CompilerParams(
                dimension_semantics=("parallel", "parallel", "arbitrary"),
                vmem_limit_bytes=vmem_limit),
            cost_estimate=cost,
        )(xp, wp, bp)

    return out[:B, :n_dim]


# --------------------------------------------------------------------------
# Demo / self-check
# --------------------------------------------------------------------------
if __name__ == "__main__":
    key = jax.random.PRNGKey(0)
    k_x, k_w, k_b = jax.random.split(key, 3)

    # Input: batch=2, channels=4, spatial=16x16 -> flattens to n_dim = 1024.
    B, C, H, W = 2, 4, 16, 16
    n_dim = C * H * W
    x = jax.random.normal(k_x, (B, C, H, W), dtype=jnp.float32)

    # Deterministic nn.Linear(n_dim, n_dim) params (PyTorch layout [out, in]).
    bound = 1.0 / (n_dim ** 0.5)
    weight = jax.random.uniform(k_w, (n_dim, n_dim), jnp.float32, -bound, bound)
    bias = jax.random.uniform(k_b, (n_dim,), jnp.float32, -bound, bound)

    # Pad + bf16-cast the weights ONCE, outside the per-call hot path.
    params = prepare_clientnet(weight, bias, compute_dtype=jnp.bfloat16,
                               out_dtype=jnp.float32, batch_hint=B)

    out = jax.block_until_ready(clientnet_forward(x, params))
    assert out.shape == (B, n_dim)

    # Reference 1 (kernel correctness): f64 matmul from the same bf16-quantized
    # operands the kernel streams -> only f32-accumulation error remains.
    xq = np.asarray(jnp.asarray(x, jnp.bfloat16).astype(jnp.float32),
                    dtype=np.float64).reshape(B, -1)
    wq = np.asarray(jnp.asarray(weight, jnp.bfloat16).astype(jnp.float32),
                    dtype=np.float64)
    b64 = np.asarray(bias, dtype=np.float64)
    ref_q = np.maximum(xq @ wq.T + b64, 0.0)
    np.testing.assert_allclose(np.asarray(out, dtype=np.float64), ref_q,
                               atol=2e-3, rtol=2e-3)

    # Reference 2 (end-to-end vs full-precision PyTorch semantics): looser
    # tolerance covering the bf16 streaming of x / W over a K=1024 contraction.
    x64 = np.asarray(x, dtype=np.float64).reshape(B, -1)
    w64 = np.asarray(weight, dtype=np.float64)
    ref_full = np.maximum(x64 @ w64.T + b64, 0.0)
    np.testing.assert_allclose(np.asarray(out, dtype=np.float64), ref_full,
                               atol=5e-2, rtol=5e-2)

    print("KERNEL_OK")
</pallas_src>

<mosaic_0001>
module attributes {stable_mosaic.version = 11 : i64} {
  func.func @_clientnet_kernel_fused(%arg0: i32, %arg1: i32, %arg2: memref<8x1024xbf16, #tpu.memory_space<vmem>>, %arg3: memref<512x1024xbf16, #tpu.memory_space<vmem>>, %arg4: memref<1x512xf32, #tpu.memory_space<vmem>>, %arg5: memref<8x512xf32, #tpu.memory_space<vmem>>) attributes {dimension_semantics = [#tpu.dimension_semantics<parallel>, #tpu.dimension_semantics<parallel>], iteration_bounds = array<i64: 1, 2>, scalar_prefetch = 0 : i64, scratch_operands = 0 : i64, tpu.core_type = #tpu.core_type<tc>, window_params = [{transform_indices = @transform_0, window_bounds = array<i64: 8, 1024>}, {transform_indices = @transform_1, window_bounds = array<i64: 512, 1024>}, {transform_indices = @transform_2, window_bounds = array<i64: 1, 512>}, {transform_indices = @transform_3, window_bounds = array<i64: 8, 512>}]} {
    %c0 = arith.constant 0 : index
    %c0_0 = arith.constant 0 : index
    %0 = vector.load %arg2[%c0, %c0_0] : memref<8x1024xbf16, #tpu.memory_space<vmem>>, vector<8x1024xbf16>
    %c0_1 = arith.constant 0 : index
    %c0_2 = arith.constant 0 : index
    %1 = vector.load %arg3[%c0_1, %c0_2] : memref<512x1024xbf16, #tpu.memory_space<vmem>>, vector<512x1024xbf16>
    %cst = arith.constant dense<0.000000e+00> : vector<8x512xf32>
    %2 = tpu.matmul %0, %1, %cst {dimension_numbers = #tpu.dot_dimension_numbers<[1], [1], [0], [0], [0, 0, 1, 0], [], []>} : vector<8x1024xbf16>, vector<512x1024xbf16>, vector<8x512xf32> -> vector<8x512xf32>
    %c0_3 = arith.constant 0 : index
    %c0_4 = arith.constant 0 : index
    %3 = vector.load %arg4[%c0_3, %c0_4] : memref<1x512xf32, #tpu.memory_space<vmem>>, vector<1x512xf32>
    %4 = vector.broadcast %3 : vector<1x512xf32> to vector<8x512xf32>
    %5 = arith.addf %2, %4 : vector<8x512xf32>
    %cst_5 = arith.constant 0.000000e+00 : f32
    %6 = vector.broadcast %cst_5 : f32 to vector<8x512xf32>
    %7 = arith.maximumf %5, %6 : vector<8x512xf32>
    %c0_6 = arith.constant 0 : index
    %c0_7 = arith.constant 0 : index
    %8 = vector.load %arg5[%c0_6, %c0_7] : memref<8x512xf32, #tpu.memory_space<vmem>>, vector<8x512xf32>
    tpu.vector_store %arg5[%c0_6, %c0_7], %7 {strides = array<i32>} : memref<8x512xf32, #tpu.memory_space<vmem>>, vector<8x512xf32>,
    return
  }
  func.func @transform_0(%arg0: i32, %arg1: i32) -> (i32, i32) {
    %c0_i32 = arith.constant 0 : i32
    %c0_i32_0 = arith.constant 0 : i32
    return %arg0, %c0_i32 : i32, i32
  }
  func.func @transform_1(%arg0: i32, %arg1: i32) -> (i32, i32) {
    %c0_i32 = arith.constant 0 : i32
    %c0_i32_0 = arith.constant 0 : i32
    return %arg1, %c0_i32 : i32, i32
  }
  func.func @transform_2(%arg0: i32, %arg1: i32) -> (i32, i32) {
    %c0_i32 = arith.constant 0 : i32
    %c0_i32_0 = arith.constant 0 : i32
    return %c0_i32, %arg1 : i32, i32
  }
  func.func @transform_3(%arg0: i32, %arg1: i32) -> (i32, i32) {
    %c0_i32 = arith.constant 0 : i32
    return %arg0, %arg1 : i32, i32
  }
}

</mosaic_0001>

<bundles_post_ra>
// kernel: tpu_custom_call.1
= control target key start
LH: loop header
LB: loop body
LE: loop exit
PB: predicated region body
PF: predicated region fallthrough
CT: control target
= control target key end

     0   :  { %8 = vsyncpa [#allocation3], 0  ;;  %s3408_s0 = inlined_call_operand.hbm [shape: bf16[8,1024], index: 0, kind: input, shape index: {}]   ;;  %s3409_s1 = inlined_call_operand.hbm [shape: bf16[1024,1024], index: 1, kind: input, shape index: {}]   ;;  %s3410_s2 = inlined_call_operand.hbm [shape: f32[1,1024], index: 2, kind: input, shape index: {}]   ;;  %s3411_s3 = inlined_call_operand.hbm [shape: f32[8,1024], index: 3, kind: output, shape index: {}]  }
   0x1   :  { %9 = vsyncpa [#allocation6], 0 }
   0x2   :  { %11 = vsyncpa [#allocation6 + $0x1], 0 }
   0x3   :  { %12 = vsyncpa [#allocation4], 0 }
   0x4   :  { %14 = vsyncpa [#allocation4 + $0x1], 0  ;;  %s2893_s12 = smov 0   ;;  %s2895_s13 = smov 0  }
   0x5   :  { %s2897_s14 = smov 0   ;;  %s2899_s15 = smov 0  }
   0x6   :  { %s2901_s16 = smov 0   ;;  %s2903_s17 = smov 0  }
   0x7 LB: > { %s29_s18 = sadd.s32 1, %s2861_s16  ;;  %s65_s19 = sadd.s32 1, %s2853_s14  ;;  %s2865_s17 = sphi %s2903_s17, %s20_s17   ;;  %s2861_s16 = sphi %s2901_s16, %s3434_s16   ;;  %s2857_s15 = sphi %s2899_s15, %s3433_s15   ;;  %s2853_s14 = sphi %s2897_s14, %s3432_s14   ;;  %s2849_s13 = sphi %s2895_s13, %s3431_s13   ;;  %s2845_s12 = sphi %s2893_s12, %s3430_s12  }
   0x8   : > { %p30_p0 = scmp.ge.s32.totalorder %s29_s18, 2  ;;  %p72_p1 = scmp.ne.s32.totalorder %s2853_s14, %s2849_s13 }
   0x9   : > { %p73_p2 = scmp.eq.s32.totalorder %s2865_s17, 0  ;;  %p2637_p5 = scmp.lt.s32.totalorder %s2865_s17, 2 }
   0xa   : > { %s3436_s18 = smov (%p30_p0, %s29_s18), 0  ;;  %s170_s21 = sand.u32 1, %s2865_s17  }
   0xb   : > { %p74_p4 = por %p73_p2, %p72_p1  ;;  %s62_s20 = ssub.s32 %s2861_s16, %s3436_s18 }
   0xc   : > { %p63_p6 = scmp.eq.s32.totalorder %s62_s20, 0  ;;  %s172_s22 = sand.u32 1, %s2853_s14  }
   0xd   : > { %s2608_s23 = sshll.u32 %s2861_s16, 15  ;;  %s2326_s25 = sshll.u32 %s172_s22, 11 }
   0xe   : > { %s2941_s24 = scalar_select %p63_p6, %s2853_s14, %s65_s19  }
   0xf   : > { %s181_s28 = scalar_lea.hbm %s3409_s1, %s2608_s23  ;;  %p2948_p7 = pnand %p2637_p5, %p74_p4 }
  0x10   : > { %s174_s30 = scalar_lea.vmem [#allocation5], %s2326_s25  ;;  %s2952_s5 = scalar_lea.sflag [#allocation6], %s170_s21 }
  0x11   : > { %s182_s4 = sshll.u32 %s174_s30, 4  ;;  %p3412_p8 = pneg %p2948_p7  ;;  %s183_s4 = int_to_ptr.vmem [resolvable:$true] %s182_s4 }
  0x12   : > { %s2712_s6 = scalar_lea.vmem %s183_s4, 32768  ;;  %s2867_s7 = smov [#allocation5]  }
  0x13   : > { %p2713_p9 = scmp.ne.s32.totalorder %s183_s4, %s2712_s6  ;;  %s2717_s8 = sshll.u32 %s2867_s7, 4  ;;  %s2718_s8 = int_to_ptr.vmem [resolvable:$false] %s2717_s8 }
  0x14   : > { %s2719_s9 = scalar_lea.vmem %s2718_s8, 65536  ;;  %p2720_p12 = scmp.lt.s32.totalorder %s183_s4, %s2718_s8 }
  0x15   : > { %p2715_p10 = pnand %p2713_p9, %p3412_p8  ;;  %p2721_p13 = scmp.lt.s32.totalorder %s2719_s9, %s2712_s6 }
  0x17   : > { %p2716_p11 = pneg %p2715_p10  ;;  %p2722_p0 = por %p2721_p13, %p2720_p12 }
  0x19   : > { %p2723_p2 = pnand %p2722_p0, %p2716_p11 }
  0x1b   : > { %2726 = shalt.err (!%p2723_p2)
}
  0x1c   : > { %s2868_s10 = smov 512   ;;  %s2869_s11 = smov 32  }
  0x1d   : > { %2628 = dma.hbm_to_vmem [thread:$0]  (!%p2948_p7), %s181_s28, 32768, %s183_s4, %s2952_s5, %s2868_s10, %s2868_s10, %s2869_s11  }
  0x1e   : > { %s2963_s19 = sadd.s32 4294967295, %s2865_s17   ;;  %s2322_s20 = sadd.s32 4294967294, %s2865_s17  }
  0x1f   : > { %p78_p4 = scmp.ne.s32.totalorder %s2849_s13, %s2845_s12  ;;  %p3414_p5 = scmp.eq.s32.totalorder %s2963_s19, 0 }
  0x20   : > { %p130_p6 = scmp.eq.s32.totalorder %s2963_s19, 1  ;;  %p136_p9 = scmp.eq.s32.totalorder %s2322_s20, 1 }
  0x21   : > { %p2323_p10 = scmp.ge.s32.totalorder %s2865_s17, 1  ;;  %p2973_p11 = por %p3414_p5, %p78_p4 }
  0x22   : > { %p2980_p12 = por %p130_p6, %p72_p1  ;;  %p2984_p13 = por %p136_p9, %p78_p4 }
  0x23   : > { %s3418_s21 = scalar_select %p2973_p11, 1, 0 }
  0x24   : > { %s3419_s23 = scalar_select %p2980_p12, 1, 0 }
  0x25   : > { %s3420_s25 = scalar_select %p2984_p13, 1, 0 }
  0x26   : > { %p143_p0 = scmp.lt.s32.totalorder %s2865_s17, 3  ;;  %s2870_s27 = smov [#allocation2]  }
  0x27   : > { %s159_s28 = sshll.u32 %s2870_s27, 4  ;;  %s2330_s30 = sshll.u32 %s172_s22, 2  ;;  %s160_s28 = int_to_ptr.vmem [resolvable:$true] %s159_s28 }
  0x28   : > { %p2989_p2 = pnand %p2323_p10, %p143_p0  ;;  %s2609_s4 = sshll.u32 %s2861_s16, 6 }
  0x29   : > { %s196_s6 = scalar_lea.vmem [#allocation7], %s2330_s30  ;;  %s202_s10 = scalar_lea.hbm %s3410_s2, %s2609_s4 }
  0x2a   : > { %s3421_s26 = scalar_select %p2989_p2, 1, 0 }
  0x2b   : > { %p2621_p3 = pneg %p2989_p2  ;;  %s204_s7 = sshll.u32 %s196_s6, 4  ;;  %s205_s7 = int_to_ptr.vmem [resolvable:$true] %s204_s7 }
  0x2c   : > { %s2738_s11 = scalar_lea.vmem %s160_s28, 512  ;;  %p2746_p0 = scmp.lt.s32.totalorder %s160_s28, %s160_s28 }
  0x2d   : > { %p2622_p1 = pnand %p2621_p3, %p3414_p5  ;;  %p2739_p6 = scmp.ne.s32.totalorder %s160_s28, %s2738_s11 }
  0x2e   : > { %p2747_p8 = scmp.lt.s32.totalorder %s2738_s11, %s2738_s11 }
  0x2f   : > { %p2729_p4 = pneg %p2622_p1 }
  0x30   : > { %p2748_p13 = por %p2747_p8, %p2746_p0 }
  0x31   : > { %p2741_p9 = pnand %p2739_p6, %p2729_p4 }
  0x33   : > { %p2742_p10 = pneg %p2741_p9 }
  0x35   : > { %p2749_p12 = pnand %p2748_p13, %p2742_p10 }
  0x37   : > { %2752 = shalt.err (!%p2749_p12)
}
  0x38   : > { %2624 = dma.hbm_to_vmem [thread:$0]  (!%p2622_p1), %s3408_s0, 512, %s160_s28, [#allocation3]  }
  0x39   : > { %s2766_s27 = scalar_lea.vmem %s205_s7, 64  ;;  %p3422_p5 = pneg %p2948_p7 }
  0x3a   : > { %p2767_p3 = scmp.ne.s32.totalorder %s205_s7, %s2766_s27  ;;  %s2871_s30 = smov [#allocation7]  }
  0x3b   : > { %s2771_s4 = sshll.u32 %s2871_s30, 4  ;;  %s2772_s4 = int_to_ptr.vmem [resolvable:$false] %s2771_s4 }
  0x3c   : > { %p2769_p11 = pnand %p2767_p3, %p3422_p5  ;;  %s2773_s6 = scalar_lea.vmem %s2772_s4, 128 }
  0x3d   : > { %p2774_p4 = scmp.lt.s32.totalorder %s205_s7, %s2772_s4  ;;  %p2775_p6 = scmp.lt.s32.totalorder %s2773_s6, %s2766_s27 }
  0x3e   : > { %p2770_p2 = pneg %p2769_p11 }
  0x3f   : > { %p2776_p8 = por %p2775_p6, %p2774_p4 }
  0x41   : > { %p2777_p13 = pnand %p2776_p8, %p2770_p2 }
  0x43   : > { %2780 = shalt.err (!%p2777_p13)
}
  0x44   : > { %2631 = dma.hbm_to_vmem [thread:$0]  (!%p2948_p7), %s202_s10, 64, %s205_s7, %s2952_s5  }
  0x45   : > { %p3423_p12 = scmp.ne.s32.totalorder %s3421_s26, 0 }
  0x46   : > { %p3424_p1 = scmp.eq.s32.totalorder (!%p3423_p12), %s2963_s19, 0 }
  0x47   : > { %213 = sbr.rel (%p3423_p12) target bundleno = 812 (0x32c), region = 32 }
  0x4c   : > { %2832 = dma.done.wait (%p3424_p1), [#allocation3], 512   ;;  %p3425_p5 = pmov %p3424_p1 }
  0x4d   : > { %s219_s28 = sand.u32 1, %s2963_s19   ;;  %s3020_s8 = sand.u32 1, %s2849_s13  }
  0x4e   : > { %2834 = vsyncadd (%p3425_p5), [#allocation3], 4294966784  ;;  %s2335_s9 = sshll.u32 %s3020_s8, 11  ;;  %s220_s29 = scalar_lea.sflag [#allocation6], %s219_s28 }
  0x4f   : > { %s3023_s11 = scalar_lea.vmem [#allocation5], %s2335_s9  ;;  %p3426_p7 = scmp.ne.s32.totalorder %s3418_s21, 0 }
  0x51   : > { %2836 = dma.done.wait (%p3426_p7), %s220_s29, 32832  }
  0x52   : > { %2838 = vsyncadd (%p3426_p7), %s220_s29, 4294934464  ;;  %v323_v0 = vld [vmem:[%s3023_s11 + $0x1c0] sm:$0xff]  ;;  %v324_v2 = vld [vmem:[%s3023_s11 + $0x1c8] sm:$0xff]  ;;  %s2336_s5 = sshll.u32 %s3020_s8, 2  ;;  %s2337_s21 = sshll.u32 %s3020_s8, 5 }
  0x53   : > { %v327_v1 = vld [vmem:[%s3023_s11 + $0x1e0] sm:$0xff]  ;;  %v328_v4 = vld [vmem:[%s3023_s11 + $0x1e8] sm:$0xff]  ;;  %s232_s19 = scalar_lea.vmem [#allocation7], %s2336_s5  ;;  %s3335_s26 = scalar_lea.vmem [#allocation8], %s2337_s21 }
  0x54   : > { %v2403_v3 = vcombine.high %v323_v0, %v327_v1  ;;  %v2402_v5 = vcombine.low %v323_v0, %v327_v1  ;;  %v315_v6 = vld [vmem:[%s3023_s11 + $0x180] sm:$0xff]  ;;  %v2405_v8 = vcombine.high %v324_v2, %v328_v4  ;;  %v2404_v9 = vcombine.low %v324_v2, %v328_v4  ;;  %v316_v11 = vld [vmem:[%s3023_s11 + $0x188] sm:$0xff]  ;;  %s2610_s7 = sshll.u32 %s2857_s15, 9  ;;  %s2206_s10 = sshll.u32 %s3335_s26, 4  ;;  %s2207_s10 = int_to_ptr.vmem [resolvable:$true] %s2206_s10 }
  0x55   : > { %v319_v7 = vld [vmem:[%s3023_s11 + $0x1a0] sm:$0xff]  ;;  %v320_v12 = vld [vmem:[%s3023_s11 + $0x1a8] sm:$0xff]  ;;  %s2204_s27 = scalar_lea.hbm %s3411_s3, %s2610_s7  ;;  %s2190_s30 = scalar_lea.sflag [#allocation4], %s3020_s8 }
  0x56   : > { %v2395_v10 = vcombine.high %v315_v6, %v319_v7  ;;  %1853 = vmatprep.subr.bf16.mxu0 %v2403_v3  ;;  %v2397_v13 = vcombine.high %v316_v11, %v320_v12  ;;  %1894 = vmatprep.subr.bf16.mxu1 %v2405_v8  ;;  %v307_v14 = vld [vmem:[%s3023_s11 + $0x140] sm:$0xff]  ;;  %v308_v16 = vld [vmem:[%s3023_s11 + $0x148] sm:$0xff]  ;;  %v2394_v18 = vcombine.low %v315_v6, %v319_v7  ;;  %s2781_s4 = scalar_lea.vmem %s2207_s10, 512  ;;  %p3427_p2 = scmp.ne.s32.totalorder %s3419_s23, 0 }
  0x57   : > { %1854 = vmatpush1.bf16.xpose.msra.mxu0 %v2402_v5  ;;  %1895 = vmatpush1.bf16.xpose.msra.mxu1 %v2404_v9  ;;  %v311_v15 = vld [vmem:[%s3023_s11 + $0x160] sm:$0xff]  ;;  %v312_v17 = vld [vmem:[%s3023_s11 + $0x168] sm:$0xff]  ;;  %v2396_v19 = vcombine.low %v316_v11, %v320_v12  ;;  %p2782_p11 = scmp.ne.s32.totalorder %s2207_s10, %s2781_s4  ;;  %s2872_s15 = smov [#allocation8]  }
  0x58   : > { %1855 = vmatprep.subr.bf16.mxu0 %v2395_v10  ;;  %1896 = vmatprep.subr.bf16.mxu1 %v2397_v13  ;;  %v2387_v20 = vcombine.high %v307_v14, %v311_v15  ;;  %v2389_v21 = vcombine.high %v308_v16, %v312_v17  ;;  %v299_v22 = vld [vmem:[%s3023_s11 + $0x100] sm:$0xff]  ;;  %v300_v24 = vld [vmem:[%s3023_s11 + $0x108] sm:$0xff]  ;;  %v2386_v26 = vcombine.low %v307_v14, %v311_v15  ;;  %s2785_s6 = sshll.u32 %s2872_s15, 4  ;;  %s2786_s6 = int_to_ptr.vmem [resolvable:$false] %s2785_s6 }
  0x59   : > { %v303_v23 = vld [vmem:[%s3023_s11 + $0x120] sm:$0xff]  ;;  %v304_v25 = vld [vmem:[%s3023_s11 + $0x128] sm:$0xff]  ;;  %v2388_v27 = vcombine.low %v308_v16, %v312_v17  ;;  %p2783_p9 = pnand %p2782_p11, %p3427_p2  ;;  %s2787_s28 = scalar_lea.vmem %s2786_s6, 1024 }
  0x5a   : > { %v2379_v28 = vcombine.high %v299_v22, %v303_v23  ;;  %v2381_v29 = vcombine.high %v300_v24, %v304_v25  ;;  %v3045_v30 = vld [vmem:[#allocation2] sm:$0xff]  ;;  %v3047_v31 = vld [vmem:[#allocation2 + $0x8] sm:$0xff]  ;;  %v2378_v38 = vcombine.low %v299_v22, %v303_v23  ;;  %v2380_v39 = vcombine.low %v300_v24, %v304_v25  ;;  %p2788_p0 = scmp.lt.s32.totalorder %s2207_s10, %s2786_s6  ;;  %p2789_p3 = scmp.lt.s32.totalorder %s2787_s28, %s2781_s4 }
  0x5b   : > { %v291_v32 = vld [vmem:[%s3023_s11 + $0xc0] sm:$0xff]  ;;  %v3053_v34 = vcombine.high %v3045_v30, %v3045_v30  ;;  %v292_v35 = vld [vmem:[%s3023_s11 + $0xc8] sm:$0xff]  ;;  %v3059_v37 = vcombine.high %v3047_v31, %v3047_v31  ;;  %p2784_p10 = pneg %p2783_p9 }
  0x5c   : > { %v295_v33 = vld [vmem:[%s3023_s11 + $0xe0] sm:$0xff]  ;;  %v296_v36 = vld [vmem:[%s3023_s11 + $0xe8] sm:$0xff]  ;;  %p2790_p4 = por %p2789_p3, %p2788_p0 }
  0x5d   : > { %1885 = vmatprep.mubr.bf16.mxu0 %v3053_v34  ;;  %v2371_v40 = vcombine.high %v291_v32, %v295_v33  ;;  %1926 = vmatprep.mubr.bf16.mxu1 %v3059_v37  ;;  %v2373_v41 = vcombine.high %v292_v35, %v296_v36  ;;  %v283_v42 = vld [vmem:[%s3023_s11 + $0x80] sm:$0xff]  ;;  %v284_v44 = vld [vmem:[%s3023_s11 + $0x88] sm:$0xff]  ;;  %v2370_v46 = vcombine.low %v291_v32, %v295_v33 }
  0x5e   : > { %v287_v43 = vld [vmem:[%s3023_s11 + $0xa0] sm:$0xff]  ;;  %v288_v45 = vld [vmem:[%s3023_s11 + $0xa8] sm:$0xff]  ;;  %v2372_v47 = vcombine.low %v292_v35, %v296_v36  ;;  %p2791_p6 = pnand %p2790_p4, %p2784_p10 }
  0x5f   : > { %1856 = vmatpush1.bf16.xpose.msra.mxu0 %v2394_v18  ;;  %1897 = vmatpush1.bf16.xpose.msra.mxu1 %v2396_v19  ;;  %v2363_v48 = vcombine.high %v283_v42, %v287_v43  ;;  %v2365_v49 = vcombine.high %v284_v44, %v288_v45  ;;  %v275_v50 = vld [vmem:[%s3023_s11 + $0x40] sm:$0xff]  ;;  %v276_v52 = vld [vmem:[%s3023_s11 + $0x48] sm:$0xff]  ;;  %v2362_v54 = vcombine.low %v283_v42, %v287_v43 }
  0x60   : > { %1857 = vmatprep.subr.bf16.mxu0 %v2387_v20  ;;  %1898 = vmatprep.subr.bf16.mxu1 %v2389_v21  ;;  %v279_v51 = vld [vmem:[%s3023_s11 + $0x60] sm:$0xff]  ;;  %v280_v53 = vld [vmem:[%s3023_s11 + $0x68] sm:$0xff]  ;;  %v2364_v55 = vcombine.low %v284_v44, %v288_v45 }
  0x61   : > { %v2355_v56 = vcombine.high %v275_v50, %v279_v51  ;;  %v2357_v57 = vcombine.high %v276_v52, %v280_v53  ;;  %v267_v58 = vld [vmem:[%s3023_s11] sm:$0xff]  ;;  %v268_v60 = vld [vmem:[%s3023_s11 + $0x8] sm:$0xff]  ;;  %v2354_v62 = vcombine.low %v275_v50, %v279_v51  ;;  %v2356_v63 = vcombine.low %v276_v52, %v280_v53 }
  0x62   : > { %v271_v59 = vld [vmem:[%s3023_s11 + $0x20] sm:$0xff]  ;;  %v272_v61 = vld [vmem:[%s3023_s11 + $0x28] sm:$0xff] }
  0x63   : > { %v2347_v0 = vcombine.high %v267_v58, %v271_v59  ;;  %v2349_v1 = vcombine.high %v268_v60, %v272_v61  ;;  %v387_v2 = vld [vmem:[%s3023_s11 + $0x3c0] sm:$0xff]  ;;  %v388_v4 = vld [vmem:[%s3023_s11 + $0x3c8] sm:$0xff]  ;;  %v2346_v6 = vcombine.low %v267_v58, %v271_v59  ;;  %v2348_v7 = vcombine.low %v268_v60, %v272_v61 }
  0x64   : > { %v391_v3 = vld [vmem:[%s3023_s11 + $0x3e0] sm:$0xff]  ;;  %v392_v5 = vld [vmem:[%s3023_s11 + $0x3e8] sm:$0xff] }
  0x65   : > { %v2467_v8 = vcombine.high %v387_v2, %v391_v3  ;;  %v2469_v9 = vcombine.high %v388_v4, %v392_v5  ;;  %v379_v10 = vld [vmem:[%s3023_s11 + $0x380] sm:$0xff]  ;;  %v380_v12 = vld [vmem:[%s3023_s11 + $0x388] sm:$0xff]  ;;  %v2466_v14 = vcombine.low %v387_v2, %v391_v3  ;;  %v2468_v15 = vcombine.low %v388_v4, %v392_v5 }
  0x66   : > { %v383_v11 = vld [vmem:[%s3023_s11 + $0x3a0] sm:$0xff]  ;;  %v384_v13 = vld [vmem:[%s3023_s11 + $0x3a8] sm:$0xff] }
  0x67   : > { %1858 = vmatpush1.bf16.xpose.msra.mxu0 %v2386_v26  ;;  %1899 = vmatpush1.bf16.xpose.msra.mxu1 %v2388_v27  ;;  %v2459_v16 = vcombine.high %v379_v10, %v383_v11  ;;  %v2461_v17 = vcombine.high %v380_v12, %v384_v13  ;;  %v371_v18 = vld [vmem:[%s3023_s11 + $0x340] sm:$0xff]  ;;  %v372_v20 = vld [vmem:[%s3023_s11 + $0x348] sm:$0xff]  ;;  %v2458_v22 = vcombine.low %v379_v10, %v383_v11 }
  0x68   : > { %1859 = vmatprep.subr.bf16.mxu0 %v2379_v28  ;;  %1900 = vmatprep.subr.bf16.mxu1 %v2381_v29  ;;  %v375_v19 = vld [vmem:[%s3023_s11 + $0x360] sm:$0xff]  ;;  %v376_v21 = vld [vmem:[%s3023_s11 + $0x368] sm:$0xff]  ;;  %v2460_v23 = vcombine.low %v380_v12, %v384_v13 }
  0x69   : > { %v2451_v24 = vcombine.high %v371_v18, %v375_v19  ;;  %v2453_v25 = vcombine.high %v372_v20, %v376_v21  ;;  %v363_v26 = vld [vmem:[%s3023_s11 + $0x300] sm:$0xff]  ;;  %v364_v28 = vld [vmem:[%s3023_s11 + $0x308] sm:$0xff]  ;;  %v2450_v32 = vcombine.low %v371_v18, %v375_v19  ;;  %v2452_v33 = vcombine.low %v372_v20, %v376_v21  ;;  %v322_v18 = vld [vmem:[%s3023_s11 + $0x1b8] sm:$0xff] }
  0x6a   : > { %v367_v27 = vld [vmem:[%s3023_s11 + $0x320] sm:$0xff]  ;;  %v368_v29 = vld [vmem:[%s3023_s11 + $0x328] sm:$0xff]  ;;  %v3119_v19 = vld [vmem:[#allocation2 + $0x10] sm:$0xff]  ;;  %v3123_v20 = vcombine.low %v3047_v31, %v3047_v31 }
  0x6b   : > { %v2443_v35 = vcombine.high %v363_v26, %v367_v27  ;;  %v2445_v36 = vcombine.high %v364_v28, %v368_v29  ;;  %v2442_v42 = vcombine.low %v363_v26, %v367_v27  ;;  %v2444_v43 = vcombine.low %v364_v28, %v368_v29  ;;  %v309_v31 = vld [vmem:[%s3023_s11 + $0x150] sm:$0xff]  ;;  %v310_v28 = vld [vmem:[%s3023_s11 + $0x158] sm:$0xff] }
  0x6c   : > { %v313_v27 = vld [vmem:[%s3023_s11 + $0x170] sm:$0xff]  ;;  %v314_v29 = vld [vmem:[%s3023_s11 + $0x178] sm:$0xff] }
  0x6f   : > { %1860 = vmatpush1.bf16.xpose.msra.mxu0 %v2378_v38  ;;  %1901 = vmatpush1.bf16.xpose.msra.mxu1 %v2380_v39  ;;  %v355_v38 = vld [vmem:[%s3023_s11 + $0x2c0] sm:$0xff] }
  0x70   : > { %1861 = vmatprep.subr.bf16.mxu0 %v2371_v40  ;;  %1902 = vmatprep.subr.bf16.mxu1 %v2373_v41  ;;  %v359_v39 = vld [vmem:[%s3023_s11 + $0x2e0] sm:$0xff]  ;;  %v356_v40 = vld [vmem:[%s3023_s11 + $0x2c8] sm:$0xff] }
  0x71   : > { %v360_v41 = vld [vmem:[%s3023_s11 + $0x2e8] sm:$0xff]  ;;  %v2435_v44 = vcombine.high %v355_v38, %v359_v39  ;;  %v2434_v50 = vcombine.low %v355_v38, %v359_v39  ;;  %v301_v38 = vld [vmem:[%s3023_s11 + $0x110] sm:$0xff] }
  0x72   : > { %v2437_v45 = vcombine.high %v356_v40, %v360_v41  ;;  %v2436_v51 = vcombine.low %v356_v40, %v360_v41  ;;  %v305_v39 = vld [vmem:[%s3023_s11 + $0x130] sm:$0xff]  ;;  %v302_v40 = vld [vmem:[%s3023_s11 + $0x118] sm:$0xff] }
  0x73   : > { %v306_v41 = vld [vmem:[%s3023_s11 + $0x138] sm:$0xff] }
  0x77   : > { %1862 = vmatpush1.bf16.xpose.msra.mxu0 %v2370_v46  ;;  %1903 = vmatpush1.bf16.xpose.msra.mxu1 %v2372_v47  ;;  %v347_v46 = vld [vmem:[%s3023_s11 + $0x280] sm:$0xff] }
  0x78   : > { %1863 = vmatprep.subr.bf16.mxu0 %v2363_v48  ;;  %1904 = vmatprep.subr.bf16.mxu1 %v2365_v49  ;;  %v351_v47 = vld [vmem:[%s3023_s11 + $0x2a0] sm:$0xff]  ;;  %v348_v48 = vld [vmem:[%s3023_s11 + $0x288] sm:$0xff] }
  0x79   : > { %v352_v49 = vld [vmem:[%s3023_s11 + $0x2a8] sm:$0xff]  ;;  %v2427_v52 = vcombine.high %v347_v46, %v351_v47  ;;  %v2426_v58 = vcombine.low %v347_v46, %v351_v47  ;;  %v293_v46 = vld [vmem:[%s3023_s11 + $0xd0] sm:$0xff] }
  0x7a   : > { %v2429_v53 = vcombine.high %v348_v48, %v352_v49  ;;  %v2428_v59 = vcombine.low %v348_v48, %v352_v49  ;;  %v297_v47 = vld [vmem:[%s3023_s11 + $0xf0] sm:$0xff]  ;;  %v294_v48 = vld [vmem:[%s3023_s11 + $0xd8] sm:$0xff] }
  0x7b   : > { %v298_v49 = vld [vmem:[%s3023_s11 + $0xf8] sm:$0xff] }
  0x7f   : > { %1864 = vmatpush1.bf16.xpose.msra.mxu0 %v2362_v54  ;;  %1905 = vmatpush1.bf16.xpose.msra.mxu1 %v2364_v55  ;;  %v339_v54 = vld [vmem:[%s3023_s11 + $0x240] sm:$0xff] }
  0x80   : > { %1865 = vmatprep.subr.bf16.mxu0 %v2355_v56  ;;  %1906 = vmatprep.subr.bf16.mxu1 %v2357_v57  ;;  %v343_v55 = vld [vmem:[%s3023_s11 + $0x260] sm:$0xff]  ;;  %v340_v56 = vld [vmem:[%s3023_s11 + $0x248] sm:$0xff] }
  0x81   : > { %v344_v57 = vld [vmem:[%s3023_s11 + $0x268] sm:$0xff]  ;;  %v2419_v60 = vcombine.high %v339_v54, %v343_v55  ;;  %v2418_v2 = vcombine.low %v339_v54, %v343_v55  ;;  %v285_v54 = vld [vmem:[%s3023_s11 + $0x90] sm:$0xff] }
  0x82   : > { %v2421_v61 = vcombine.high %v340_v56, %v344_v57  ;;  %v2420_v3 = vcombine.low %v340_v56, %v344_v57  ;;  %v289_v55 = vld [vmem:[%s3023_s11 + $0xb0] sm:$0xff]  ;;  %v286_v56 = vld [vmem:[%s3023_s11 + $0x98] sm:$0xff] }
  0x83   : > { %v290_v57 = vld [vmem:[%s3023_s11 + $0xb8] sm:$0xff] }
  0x87   : > { %1866 = vmatpush1.bf16.xpose.msra.mxu0 %v2354_v62  ;;  %1907 = vmatpush1.bf16.xpose.msra.mxu1 %v2356_v63  ;;  %v331_v62 = vld [vmem:[%s3023_s11 + $0x200] sm:$0xff] }
  0x88   : > { %1867 = vmatprep.subr.bf16.mxu0 %v2347_v0  ;;  %1908 = vmatprep.subr.bf16.mxu1 %v2349_v1  ;;  %v335_v63 = vld [vmem:[%s3023_s11 + $0x220] sm:$0xff]  ;;  %v332_v0 = vld [vmem:[%s3023_s11 + $0x208] sm:$0xff] }
  0x89   : > { %v336_v1 = vld [vmem:[%s3023_s11 + $0x228] sm:$0xff]  ;;  %v2411_v4 = vcombine.high %v331_v62, %v335_v63  ;;  %v2410_v10 = vcombine.low %v331_v62, %v335_v63  ;;  %v277_v62 = vld [vmem:[%s3023_s11 + $0x50] sm:$0xff] }
  0x8a   : > { %v2413_v5 = vcombine.high %v332_v0, %v336_v1  ;;  %v2412_v11 = vcombine.low %v332_v0, %v336_v1  ;;  %v281_v63 = vld [vmem:[%s3023_s11 + $0x70] sm:$0xff]  ;;  %v278_v0 = vld [vmem:[%s3023_s11 + $0x58] sm:$0xff] }
  0x8b   : > { %v282_v1 = vld [vmem:[%s3023_s11 + $0x78] sm:$0xff] }
  0x8f   : > { %1868 = vmatpush1.bf16.xpose.msra.mxu0 %v2346_v6  ;;  %1909 = vmatpush1.bf16.xpose.msra.mxu1 %v2348_v7  ;;  %v325_v6 = vld [vmem:[%s3023_s11 + $0x1d0] sm:$0xff] }
  0x90   : > { %1869 = vmatprep.subr.bf16.mxu0 %v2467_v8  ;;  %1910 = vmatprep.subr.bf16.mxu1 %v2469_v9  ;;  %v329_v7 = vld [vmem:[%s3023_s11 + $0x1f0] sm:$0xff]  ;;  %v326_v8 = vld [vmem:[%s3023_s11 + $0x1d8] sm:$0xff] }
  0x91   : > { %v330_v9 = vld [vmem:[%s3023_s11 + $0x1f8] sm:$0xff]  ;;  %v2407_v12 = vcombine.high %v325_v6, %v329_v7  ;;  %v2406_v21 = vcombine.low %v325_v6, %v329_v7  ;;  %v269_v6 = vld [vmem:[%s3023_s11 + $0x10] sm:$0xff] }
  0x92   : > { %v2409_v13 = vcombine.high %v326_v8, %v330_v9  ;;  %v273_v7 = vld [vmem:[%s3023_s11 + $0x30] sm:$0xff] }
  0x97   : > { %1870 = vmatpush2.bf16.xpose.msra.mxu0 %v2466_v14  ;;  %1911 = vmatpush2.bf16.xpose.msra.mxu1 %v2468_v15  ;;  %v317_v14 = vld [vmem:[%s3023_s11 + $0x190] sm:$0xff] }
  0x98   : > { %1871 = vmatprep.subr.bf16.mxu0 %v2459_v16  ;;  %1912 = vmatprep.subr.bf16.mxu1 %v2461_v17  ;;  %v321_v15 = vld [vmem:[%s3023_s11 + $0x1b0] sm:$0xff]  ;;  %v3115_v16 = vcombine.low %v3045_v30, %v3045_v30  ;;  %v318_v17 = vld [vmem:[%s3023_s11 + $0x198] sm:$0xff]  ;;  %v3129_v30 = vcombine.high %v3119_v19, %v3119_v19 }
  0x9f   : > { %1872 = vmatpush2.bf16.xpose.msra.mxu0 %v2458_v22  ;;  %1913 = vmatpush2.bf16.xpose.msra.mxu1 %v2460_v23  ;;  %v3125_v22 = vld [vmem:[#allocation2 + $0x18] sm:$0xff]  ;;  %v2408_v23 = vcombine.low %v326_v8, %v330_v9 }
  0xa0   : > { %1873 = vmatprep.subr.bf16.mxu0 %v2451_v24  ;;  %1914 = vmatprep.subr.bf16.mxu1 %v2453_v25  ;;  %v2399_v24 = vcombine.high %v317_v14, %v321_v15  ;;  %v2401_v25 = vcombine.high %v318_v17, %v322_v18  ;;  %v3134_v26 = vcombine.high %v3125_v22, %v3125_v22  ;;  %v270_v8 = vld [vmem:[%s3023_s11 + $0x18] sm:$0xff] }
  0xa1   : > { %v274_v9 = vld [vmem:[%s3023_s11 + $0x38] sm:$0xff] }
  0xa7   : > { %1874 = vmatpush2.bf16.xpose.msra.mxu0 %v2450_v32  ;;  %1915 = vmatpush2.bf16.xpose.msra.mxu1 %v2452_v33  ;;  %v2398_v32 = vcombine.low %v317_v14, %v321_v15  ;;  %v2400_v33 = vcombine.low %v318_v17, %v322_v18  ;;  %v389_v14 = vld [vmem:[%s3023_s11 + $0x3d0] sm:$0xff]  ;;  %v390_v17 = vld [vmem:[%s3023_s11 + $0x3d8] sm:$0xff] }
  0xa8   : > { %1875 = vmatprep.subr.bf16.mxu0 %v2443_v35  ;;  %1916 = vmatprep.subr.bf16.mxu1 %v2445_v36  ;;  %v2391_v35 = vcombine.high %v309_v31, %v313_v27  ;;  %v2393_v36 = vcombine.high %v310_v28, %v314_v29  ;;  %v393_v15 = vld [vmem:[%s3023_s11 + $0x3f0] sm:$0xff]  ;;  %v394_v18 = vld [vmem:[%s3023_s11 + $0x3f8] sm:$0xff] }
  0xaf   : > { %1876 = vmatpush2.bf16.xpose.msra.mxu0 %v2442_v42  ;;  %1917 = vmatpush2.bf16.xpose.msra.mxu1 %v2444_v43  ;;  %v2390_v42 = vcombine.low %v309_v31, %v313_v27  ;;  %v2392_v43 = vcombine.low %v310_v28, %v314_v29  ;;  %v381_v31 = vld [vmem:[%s3023_s11 + $0x390] sm:$0xff]  ;;  %v382_v28 = vld [vmem:[%s3023_s11 + $0x398] sm:$0xff] }
  0xb0   : > { %1877 = vmatprep.subr.bf16.mxu0 %v2435_v44  ;;  %1918 = vmatprep.subr.bf16.mxu1 %v2437_v45  ;;  %v2383_v44 = vcombine.high %v301_v38, %v305_v39  ;;  %v2385_v45 = vcombine.high %v302_v40, %v306_v41  ;;  %v385_v27 = vld [vmem:[%s3023_s11 + $0x3b0] sm:$0xff]  ;;  %v386_v29 = vld [vmem:[%s3023_s11 + $0x3b8] sm:$0xff] }
  0xb7   : > { %1878 = vmatpush2.bf16.xpose.msra.mxu0 %v2434_v50  ;;  %1919 = vmatpush2.bf16.xpose.msra.mxu1 %v2436_v51  ;;  %v2382_v50 = vcombine.low %v301_v38, %v305_v39  ;;  %v2384_v51 = vcombine.low %v302_v40, %v306_v41  ;;  %v373_v38 = vld [vmem:[%s3023_s11 + $0x350] sm:$0xff]  ;;  %v374_v40 = vld [vmem:[%s3023_s11 + $0x358] sm:$0xff] }
  0xb8   : > { %1879 = vmatprep.subr.bf16.mxu0 %v2427_v52  ;;  %1920 = vmatprep.subr.bf16.mxu1 %v2429_v53  ;;  %v2375_v52 = vcombine.high %v293_v46, %v297_v47  ;;  %v2377_v53 = vcombine.high %v294_v48, %v298_v49  ;;  %v377_v39 = vld [vmem:[%s3023_s11 + $0x370] sm:$0xff]  ;;  %v378_v41 = vld [vmem:[%s3023_s11 + $0x378] sm:$0xff] }
  0xbf   : > { %1880 = vmatpush2.bf16.xpose.msra.mxu0 %v2426_v58  ;;  %1921 = vmatpush2.bf16.xpose.msra.mxu1 %v2428_v59  ;;  %v2374_v58 = vcombine.low %v293_v46, %v297_v47  ;;  %v2376_v59 = vcombine.low %v294_v48, %v298_v49  ;;  %v365_v46 = vld [vmem:[%s3023_s11 + $0x310] sm:$0xff]  ;;  %v366_v48 = vld [vmem:[%s3023_s11 + $0x318] sm:$0xff] }
  0xc0   : > { %1881 = vmatprep.subr.bf16.mxu0 %v2419_v60  ;;  %1922 = vmatprep.subr.bf16.mxu1 %v2421_v61  ;;  %v2367_v60 = vcombine.high %v285_v54, %v289_v55  ;;  %v2369_v61 = vcombine.high %v286_v56, %v290_v57  ;;  %v369_v47 = vld [vmem:[%s3023_s11 + $0x330] sm:$0xff]  ;;  %v370_v49 = vld [vmem:[%s3023_s11 + $0x338] sm:$0xff] }
  0xc7   : > { %1882 = vmatpush2.bf16.xpose.msra.mxu0 %v2418_v2  ;;  %1923 = vmatpush2.bf16.xpose.msra.mxu1 %v2420_v3  ;;  %v2366_v2 = vcombine.low %v285_v54, %v289_v55  ;;  %v2368_v3 = vcombine.low %v286_v56, %v290_v57  ;;  %v357_v54 = vld [vmem:[%s3023_s11 + $0x2d0] sm:$0xff]  ;;  %v358_v56 = vld [vmem:[%s3023_s11 + $0x2d8] sm:$0xff] }
  0xc8   : > { %1883 = vmatprep.subr.bf16.mxu0 %v2411_v4  ;;  %1924 = vmatprep.subr.bf16.mxu1 %v2413_v5  ;;  %v2359_v4 = vcombine.high %v277_v62, %v281_v63  ;;  %v2361_v5 = vcombine.high %v278_v0, %v282_v1  ;;  %v361_v55 = vld [vmem:[%s3023_s11 + $0x2f0] sm:$0xff]  ;;  %v362_v57 = vld [vmem:[%s3023_s11 + $0x2f8] sm:$0xff] }
  0xcf   : > { %1884 = vmatpush2.bf16.xpose.msra.mxu0 %v2410_v10  ;;  %1925 = vmatpush2.bf16.xpose.msra.mxu1 %v2412_v11  ;;  %v2358_v10 = vcombine.low %v277_v62, %v281_v63  ;;  %v2360_v11 = vcombine.low %v278_v0, %v282_v1  ;;  %v349_v62 = vld [vmem:[%s3023_s11 + $0x290] sm:$0xff]  ;;  %v350_v0 = vld [vmem:[%s3023_s11 + $0x298] sm:$0xff] }
  0xd0   : > { %1935 = vmatprep.subr.bf16.mxu0 %v2407_v12  ;;  %1976 = vmatprep.subr.bf16.mxu1 %v2409_v13  ;;  %v2351_v12 = vcombine.high %v269_v6, %v273_v7  ;;  %v2353_v13 = vcombine.high %v270_v8, %v274_v9  ;;  %v353_v63 = vld [vmem:[%s3023_s11 + $0x2b0] sm:$0xff]  ;;  %v354_v1 = vld [vmem:[%s3023_s11 + $0x2b8] sm:$0xff] }
  0xd6   : > { %1886 = vmatmul.mubr.bf16.vlgmr.msra.gmra.mxu0 %v3115_v16  ;;  %1927 = vmatmul.mubr.bf16.vlgmr.msra.gmra.mxu1 %v3123_v20 }
  0xd7   : > { %1936 = vmatpush1.bf16.xpose.msra.mxu0 %v2406_v21  ;;  %1977 = vmatpush1.bf16.xpose.msra.mxu1 %v2408_v23  ;;  %v2350_v21 = vcombine.low %v269_v6, %v273_v7  ;;  %v2352_v23 = vcombine.low %v270_v8, %v274_v9  ;;  %v341_v6 = vld [vmem:[%s3023_s11 + $0x250] sm:$0xff]  ;;  %v342_v8 = vld [vmem:[%s3023_s11 + $0x258] sm:$0xff] }
  0xd8   : > { %1937 = vmatprep.subr.bf16.mxu0 %v2399_v24  ;;  %1978 = vmatprep.subr.bf16.mxu1 %v2401_v25  ;;  %v2471_v24 = vcombine.high %v389_v14, %v393_v15  ;;  %v2473_v25 = vcombine.high %v390_v17, %v394_v18  ;;  %v345_v7 = vld [vmem:[%s3023_s11 + $0x270] sm:$0xff]  ;;  %v346_v9 = vld [vmem:[%s3023_s11 + $0x278] sm:$0xff] }
  0xd9   : > { %1967 = vmatprep.mubr.bf16.mxu0 %v3129_v30  ;;  %2008 = vmatprep.mubr.bf16.mxu1 %v3134_v26 }
  0xdf   : > { %1938 = vmatpush1.bf16.xpose.msra.mxu0 %v2398_v32  ;;  %1979 = vmatpush1.bf16.xpose.msra.mxu1 %v2400_v33  ;;  %v2470_v32 = vcombine.low %v389_v14, %v393_v15  ;;  %v2472_v33 = vcombine.low %v390_v17, %v394_v18  ;;  %v333_v14 = vld [vmem:[%s3023_s11 + $0x210] sm:$0xff]  ;;  %v334_v17 = vld [vmem:[%s3023_s11 + $0x218] sm:$0xff] }
  0xe0   : > { %1939 = vmatprep.subr.bf16.mxu0 %v2391_v35  ;;  %1980 = vmatprep.subr.bf16.mxu1 %v2393_v36  ;;  %v2463_v35 = vcombine.high %v381_v31, %v385_v27  ;;  %v2465_v36 = vcombine.high %v382_v28, %v386_v29  ;;  %v337_v15 = vld [vmem:[%s3023_s11 + $0x230] sm:$0xff]  ;;  %v338_v18 = vld [vmem:[%s3023_s11 + $0x238] sm:$0xff] }
  0xe7   : > { %1940 = vmatpush1.bf16.xpose.msra.mxu0 %v2390_v42  ;;  %1981 = vmatpush1.bf16.xpose.msra.mxu1 %v2392_v43  ;;  %v2462_v42 = vcombine.low %v381_v31, %v385_v27  ;;  %v2464_v43 = vcombine.low %v382_v28, %v386_v29  ;;  %v451_v31 = vld [vmem:[%s3023_s11 + $0x5c0] sm:$0xff]  ;;  %v452_v28 = vld [vmem:[%s3023_s11 + $0x5c8] sm:$0xff] }
  0xe8   : > { %1941 = vmatprep.subr.bf16.mxu0 %v2383_v44  ;;  %1982 = vmatprep.subr.bf16.mxu1 %v2385_v45  ;;  %v2455_v44 = vcombine.high %v373_v38, %v377_v39  ;;  %v2457_v45 = vcombine.high %v374_v40, %v378_v41  ;;  %v455_v27 = vld [vmem:[%s3023_s11 + $0x5e0] sm:$0xff]  ;;  %v456_v29 = vld [vmem:[%s3023_s11 + $0x5e8] sm:$0xff] }
  0xef   : > { %1942 = vmatpush1.bf16.xpose.msra.mxu0 %v2382_v50  ;;  %1983 = vmatpush1.bf16.xpose.msra.mxu1 %v2384_v51  ;;  %v2454_v50 = vcombine.low %v373_v38, %v377_v39  ;;  %v2456_v51 = vcombine.low %v374_v40, %v378_v41  ;;  %v443_v38 = vld [vmem:[%s3023_s11 + $0x580] sm:$0xff]  ;;  %v3203_v40 = vcombine.low %v3119_v19, %v3119_v19  ;;  %v444_v41 = vld [vmem:[%s3023_s11 + $0x588] sm:$0xff] }
  0xf0   : > { %1943 = vmatprep.subr.bf16.mxu0 %v2375_v52  ;;  %1984 = vmatprep.subr.bf16.mxu1 %v2377_v53  ;;  %v2447_v52 = vcombine.high %v365_v46, %v369_v47  ;;  %v2449_v53 = vcombine.high %v366_v48, %v370_v49  ;;  %v447_v39 = vld [vmem:[%s3023_s11 + $0x5a0] sm:$0xff] }
  0xf1   : > { %v435_v19 = vld [vmem:[%s3023_s11 + $0x540] sm:$0xff] }
  0xf7   : > { %1944 = vmatpush1.bf16.xpose.msra.mxu0 %v2374_v58  ;;  %1985 = vmatpush1.bf16.xpose.msra.mxu1 %v2376_v59  ;;  %v2446_v58 = vcombine.low %v365_v46, %v369_v47  ;;  %v2448_v59 = vcombine.low %v366_v48, %v370_v49  ;;  %v2523_v46 = vcombine.high %v443_v38, %v447_v39  ;;  %v439_v48 = vld [vmem:[%s3023_s11 + $0x560] sm:$0xff]  ;;  %v440_v49 = vld [vmem:[%s3023_s11 + $0x568] sm:$0xff] }
  0xf8   : > { %1945 = vmatprep.subr.bf16.mxu0 %v2367_v60  ;;  %1986 = vmatprep.subr.bf16.mxu1 %v2369_v61  ;;  %v2439_v60 = vcombine.high %v357_v54, %v361_v55  ;;  %v2441_v61 = vcombine.high %v358_v56, %v362_v57 }
  0xff   : > { %1946 = vmatpush1.bf16.xpose.msra.mxu0 %v2366_v2  ;;  %1987 = vmatpush1.bf16.xpose.msra.mxu1 %v2368_v3  ;;  %v2438_v2 = vcombine.low %v357_v54, %v361_v55  ;;  %v2440_v3 = vcombine.low %v358_v56, %v362_v57  ;;  %v427_v54 = vld [vmem:[%s3023_s11 + $0x500] sm:$0xff]  ;;  %v428_v56 = vld [vmem:[%s3023_s11 + $0x508] sm:$0xff]  ;;  %v2514_v57 = vcombine.low %v435_v19, %v439_v48 }
 0x100   : > { %1947 = vmatprep.subr.bf16.mxu0 %v2359_v4  ;;  %1988 = vmatprep.subr.bf16.mxu1 %v2361_v5  ;;  %v2431_v4 = vcombine.high %v349_v62, %v353_v63  ;;  %v2433_v5 = vcombine.high %v350_v0, %v354_v1  ;;  %v431_v55 = vld [vmem:[%s3023_s11 + $0x520] sm:$0xff] }
 0x107   : > { %1948 = vmatpush1.bf16.xpose.msra.mxu0 %v2358_v10  ;;  %1989 = vmatpush1.bf16.xpose.msra.mxu1 %v2360_v11  ;;  %v2430_v10 = vcombine.low %v349_v62, %v353_v63  ;;  %v2432_v11 = vcombine.low %v350_v0, %v354_v1  ;;  %v420_v62 = vld [vmem:[%s3023_s11 + $0x4c8] sm:$0xff]  ;;  %v2506_v0 = vcombine.low %v427_v54, %v431_v55 }
 0x108   : > { %1949 = vmatprep.subr.bf16.mxu0 %v2351_v12  ;;  %1990 = vmatprep.subr.bf16.mxu1 %v2353_v13  ;;  %v2423_v12 = vcombine.high %v341_v6, %v345_v7  ;;  %v2425_v13 = vcombine.high %v342_v8, %v346_v9  ;;  %v424_v63 = vld [vmem:[%s3023_s11 + $0x4e8] sm:$0xff] }
 0x10f   : > { %1950 = vmatpush1.bf16.xpose.msra.mxu0 %v2350_v21  ;;  %1991 = vmatpush1.bf16.xpose.msra.mxu1 %v2352_v23  ;;  %v2422_v21 = vcombine.low %v341_v6, %v345_v7  ;;  %v2424_v23 = vcombine.low %v342_v8, %v346_v9  ;;  %v412_v6 = vld [vmem:[%s3023_s11 + $0x488] sm:$0xff]  ;;  %v2500_v9 = vcombine.low %v420_v62, %v424_v63 }
 0x110   : > { %1951 = vmatprep.subr.bf16.mxu0 %v2471_v24  ;;  %1992 = vmatprep.subr.bf16.mxu1 %v2473_v25  ;;  %v2415_v24 = vcombine.high %v333_v14, %v337_v15  ;;  %v2417_v25 = vcombine.high %v334_v17, %v338_v18  ;;  %v416_v7 = vld [vmem:[%s3023_s11 + $0x4a8] sm:$0xff] }
 0x117   : > { %1952 = vmatpush2.bf16.xpose.msra.mxu0 %v2470_v32  ;;  %1993 = vmatpush2.bf16.xpose.msra.mxu1 %v2472_v33  ;;  %v2414_v32 = vcombine.low %v333_v14, %v337_v15  ;;  %v2416_v33 = vcombine.low %v334_v17, %v338_v18  ;;  %v404_v14 = vld [vmem:[%s3023_s11 + $0x448] sm:$0xff]  ;;  %v2492_v18 = vcombine.low %v412_v6, %v416_v7 }
 0x118   : > { %1953 = vmatprep.subr.bf16.mxu0 %v2463_v35  ;;  %1994 = vmatprep.subr.bf16.mxu1 %v2465_v36  ;;  %v2531_v35 = vcombine.high %v451_v31, %v455_v27  ;;  %v2533_v36 = vcombine.high %v452_v28, %v456_v29  ;;  %v408_v15 = vld [vmem:[%s3023_s11 + $0x468] sm:$0xff] }
 0x11f   : > { %1954 = vmatpush2.bf16.xpose.msra.mxu0 %v2462_v42  ;;  %1995 = vmatpush2.bf16.xpose.msra.mxu1 %v2464_v43  ;;  %v448_v42 = vld [vmem:[%s3023_s11 + $0x5a8] sm:$0xff]  ;;  %v3209_v43 = vcombine.low %v3125_v22, %v3125_v22 }
 0x120   : > { %1955 = vmatprep.subr.bf16.mxu0 %v2455_v44  ;;  %1996 = vmatprep.subr.bf16.mxu1 %v2457_v45  ;;  %v2530_v44 = vcombine.low %v451_v31, %v455_v27  ;;  %v2532_v45 = vcombine.low %v452_v28, %v456_v29  ;;  %v2525_v47 = vcombine.high %v444_v41, %v448_v42  ;;  %v436_v22 = vld [vmem:[%s3023_s11 + $0x548] sm:$0xff] }
 0x121   : > { %v396_v31 = vld [vmem:[%s3023_s11 + $0x408] sm:$0xff]  ;;  %v2484_v29 = vcombine.low %v404_v14, %v408_v15 }
 0x122   : > { %v400_v27 = vld [vmem:[%s3023_s11 + $0x428] sm:$0xff] }
 0x127   : > { %1956 = vmatpush2.bf16.xpose.msra.mxu0 %v2454_v50  ;;  %1997 = vmatpush2.bf16.xpose.msra.mxu1 %v2456_v51  ;;  %v2522_v50 = vcombine.low %v443_v38, %v447_v39  ;;  %v2524_v51 = vcombine.low %v444_v41, %v448_v42  ;;  %v519_v38 = vld [vmem:[%s3023_s11 + $0x7e0] sm:$0xff]  ;;  %v516_v39 = vld [vmem:[%s3023_s11 + $0x7c8] sm:$0xff] }
 0x128   : > { %1957 = vmatprep.subr.bf16.mxu0 %v2447_v52  ;;  %1998 = vmatprep.subr.bf16.mxu1 %v2449_v53  ;;  %v2515_v52 = vcombine.high %v435_v19, %v439_v48  ;;  %v2517_v53 = vcombine.high %v436_v22, %v440_v49  ;;  %v520_v41 = vld [vmem:[%s3023_s11 + $0x7e8] sm:$0xff]  ;;  %v3247_v48 = vld [vmem:[%s232_s19] sm:$0xf] }
 0x12f   : > { %1958 = vmatpush2.bf16.xpose.msra.mxu0 %v2446_v58  ;;  %1999 = vmatpush2.bf16.xpose.msra.mxu1 %v2448_v59  ;;  %v2516_v58 = vcombine.low %v436_v22, %v440_v49  ;;  %v2507_v59 = vcombine.high %v427_v54, %v431_v55  ;;  %v507_v49 = vld [vmem:[%s3023_s11 + $0x780] sm:$0xff]  ;;  %v2596_v55 = vcombine.low %v516_v39, %v520_v41 }
 0x130   : > { %1959 = vmatprep.subr.bf16.mxu0 %v2439_v60  ;;  %2000 = vmatprep.subr.bf16.mxu1 %v2441_v61  ;;  %v419_v60 = vld [vmem:[%s3023_s11 + $0x4c0] sm:$0xff] }
 0x131   : > { %v423_v61 = vld [vmem:[%s3023_s11 + $0x4e0] sm:$0xff] }
 0x132   : > { %v2498_v8 = vcombine.low %v419_v60, %v423_v61 }
 0x137   : > { %1960 = vmatpush2.bf16.xpose.msra.mxu0 %v2438_v2  ;;  %2001 = vmatpush2.bf16.xpose.msra.mxu1 %v2440_v3  ;;  %v2499_v2 = vcombine.high %v419_v60, %v423_v61  ;;  %v2501_v3 = vcombine.high %v420_v62, %v424_v63 }
 0x138   : > { %1961 = vmatprep.subr.bf16.mxu0 %v2431_v4  ;;  %2002 = vmatprep.subr.bf16.mxu1 %v2433_v5  ;;  %v411_v4 = vld [vmem:[%s3023_s11 + $0x480] sm:$0xff] }
 0x139   : > { %v415_v5 = vld [vmem:[%s3023_s11 + $0x4a0] sm:$0xff] }
 0x13a   : > { %v2490_v17 = vcombine.low %v411_v4, %v415_v5 }
 0x13f   : > { %1962 = vmatpush2.bf16.xpose.msra.mxu0 %v2430_v10  ;;  %2003 = vmatpush2.bf16.xpose.msra.mxu1 %v2432_v11  ;;  %v2491_v10 = vcombine.high %v411_v4, %v415_v5  ;;  %v2493_v11 = vcombine.high %v412_v6, %v416_v7  ;;  %v504_v4 = vld [vmem:[%s3023_s11 + $0x768] sm:$0xff] }
 0x140   : > { %1963 = vmatprep.subr.bf16.mxu0 %v2423_v12  ;;  %2004 = vmatprep.subr.bf16.mxu1 %v2425_v13  ;;  %v403_v12 = vld [vmem:[%s3023_s11 + $0x440] sm:$0xff] }
 0x141   : > { %v407_v13 = vld [vmem:[%s3023_s11 + $0x460] sm:$0xff] }
 0x142   : > { %v2482_v28 = vcombine.low %v403_v12, %v407_v13 }
 0x147   : > { %1964 = vmatpush2.bf16.xpose.msra.mxu0 %v2422_v21  ;;  %2005 = vmatpush2.bf16.xpose.msra.mxu1 %v2424_v23  ;;  %v2483_v21 = vcombine.high %v403_v12, %v407_v13  ;;  %v2485_v23 = vcombine.high %v404_v14, %v408_v15  ;;  %v491_v13 = vld [vmem:[%s3023_s11 + $0x700] sm:$0xff]  ;;  %v492_v15 = vld [vmem:[%s3023_s11 + $0x708] sm:$0xff] }
 0x148   : > { %1965 = vmatprep.subr.bf16.mxu0 %v2415_v24  ;;  %2006 = vmatprep.subr.bf16.mxu1 %v2417_v25  ;;  %v395_v24 = vld [vmem:[%s3023_s11 + $0x400] sm:$0xff] }
 0x149   : > { %v399_v25 = vld [vmem:[%s3023_s11 + $0x420] sm:$0xff] }
 0x14a   : > { %v2474_v42 = vcombine.low %v395_v24, %v399_v25  ;;  %v495_v14 = vld [vmem:[%s3023_s11 + $0x720] sm:$0xff] }
 0x14f   : > { %1966 = vmatpush2.bf16.xpose.msra.mxu0 %v2414_v32  ;;  %2007 = vmatpush2.bf16.xpose.msra.mxu1 %v2416_v33  ;;  %v2475_v32 = vcombine.high %v395_v24, %v399_v25  ;;  %v2477_v33 = vcombine.high %v396_v31, %v400_v27  ;;  %v483_v25 = vld [vmem:[%s3023_s11 + $0x6c0] sm:$0xff] }
 0x150   : > { %2017 = vmatprep.subr.bf16.mxu0 %v2531_v35  ;;  %2058 = vmatprep.subr.bf16.mxu1 %v2533_v36  ;;  %v525_v35 = vlaneseq  ;;  %v515_v36 = vld [vmem:[%s3023_s11 + $0x7c0] sm:$0xff] }
 0x151   : > { %v2594_v54 = vcombine.low %v515_v36, %v519_v38 }
 0x156   : > { %1968 = vmatmul.mubr.bf16.vlgmr.msra.gmra.mxu0 %v3203_v40  ;;  %2009 = vmatmul.mubr.bf16.vlgmr.msra.gmra.mxu1 %v3209_v43 }
 0x157   : > { %2018 = vmatpush1.bf16.xpose.msra.mxu0 %v2530_v44  ;;  %2059 = vmatpush1.bf16.xpose.msra.mxu1 %v2532_v45  ;;  %v3244_v44 = vshrl.u32 %v525_v35, 7  ;;  %v2476_v45 = vcombine.low %v396_v31, %v400_v27  ;;  %v487_v31 = vld [vmem:[%s3023_s11 + $0x6e0] sm:$0xff]  ;;  %v484_v27 = vld [vmem:[%s3023_s11 + $0x6c8] sm:$0xff] }
 0x158   : > { %2019 = vmatprep.subr.bf16.mxu0 %v2523_v46  ;;  %2060 = vmatprep.subr.bf16.mxu1 %v2525_v47  ;;  %v2595_v46 = vcombine.high %v515_v36, %v519_v38  ;;  %v2597_v47 = vcombine.high %v516_v39, %v520_v41  ;;  %v475_v36 = vld [vmem:[%s3023_s11 + $0x680] sm:$0xff]  ;;  %v476_v39 = vld [vmem:[%s3023_s11 + $0x688] sm:$0xff] }
 0x159   : > { %2049 = vmatprep.mubr.bf16.mxu0 %v3053_v34  ;;  %2090 = vmatprep.mubr.bf16.mxu1 %v3059_v37  ;;  %v432_v34 = vld [vmem:[%s3023_s11 + $0x528] sm:$0xff]  ;;  %v527_v19 = vsub.s32 0, %v3244_v44  ;;  %v531_v22 = vsub.s32 1, %v3244_v44  ;;  %v479_v38 = vld [vmem:[%s3023_s11 + $0x6a0] sm:$0xff] }
 0x15a   : > { %v2509_v37 = vcombine.high %v428_v56, %v432_v34  ;;  %v2508_v1 = vcombine.low %v428_v56, %v432_v34  ;;  %v480_v41 = vld [vmem:[%s3023_s11 + $0x6a8] sm:$0xff] }
 0x15b   : > { %v532_v34 = vrot.slane %v3247_v48, %v531_v22  ;;  %v471_v22 = vld [vmem:[%s3023_s11 + $0x660] sm:$0xff] }
 0x15f   : > { %2020 = vmatpush1.bf16.xpose.msra.mxu0 %v2522_v50  ;;  %2061 = vmatpush1.bf16.xpose.msra.mxu1 %v2524_v51  ;;  %v511_v50 = vld [vmem:[%s3023_s11 + $0x7a0] sm:$0xff]  ;;  %v508_v51 = vld [vmem:[%s3023_s11 + $0x788] sm:$0xff] }
 0x160   : > { %2021 = vmatprep.subr.bf16.mxu0 %v2515_v52  ;;  %2062 = vmatprep.subr.bf16.mxu1 %v2517_v53  ;;  %v512_v52 = vld [vmem:[%s3023_s11 + $0x7a8] sm:$0xff]  ;;  %v528_v53 = vrot.slane %v3247_v48, %v527_v19  ;;  %v2587_v56 = vcombine.high %v507_v49, %v511_v50  ;;  %v2586_v7 = vcombine.low %v507_v49, %v511_v50  ;;  %v467_v19 = vld [vmem:[%s3023_s11 + $0x640] sm:$0xff] }
 0x161   : > { %v468_v49 = vld [vmem:[%s3023_s11 + $0x648] sm:$0xff] }
 0x162   : > { %v472_v50 = vld [vmem:[%s3023_s11 + $0x668] sm:$0xff] }
 0x167   : > { %2022 = vmatpush1.bf16.xpose.msra.mxu0 %v2514_v57  ;;  %2063 = vmatpush1.bf16.xpose.msra.mxu1 %v2516_v58  ;;  %v2589_v57 = vcombine.high %v508_v51, %v512_v52 }
 0x168   : > { %2023 = vmatprep.subr.bf16.mxu0 %v2507_v59  ;;  %2064 = vmatprep.subr.bf16.mxu1 %v2509_v37 }
 0x16f   : > { %2024 = vmatpush1.bf16.xpose.msra.mxu0 %v2506_v0  ;;  %2065 = vmatpush1.bf16.xpose.msra.mxu1 %v2508_v1  ;;  %v499_v0 = vld [vmem:[%s3023_s11 + $0x740] sm:$0xff] }
 0x170   : > { %2025 = vmatprep.subr.bf16.mxu0 %v2499_v2  ;;  %2066 = vmatprep.subr.bf16.mxu1 %v2501_v3  ;;  %v503_v1 = vld [vmem:[%s3023_s11 + $0x760] sm:$0xff]  ;;  %v500_v3 = vld [vmem:[%s3023_s11 + $0x748] sm:$0xff] }
 0x171   : > { %v2581_v12 = vcombine.high %v500_v3, %v504_v4 }
 0x177   : > { %2026 = vmatpush1.bf16.xpose.msra.mxu0 %v2498_v8  ;;  %2067 = vmatpush1.bf16.xpose.msra.mxu1 %v2500_v9  ;;  %v2588_v9 = vcombine.low %v508_v51, %v512_v52  ;;  %v2554_v51 = vcombine.low %v475_v36, %v479_v38  ;;  %v2556_v52 = vcombine.low %v476_v39, %v480_v41 }
 0x178   : > { %2027 = vmatprep.subr.bf16.mxu0 %v2491_v10  ;;  %2068 = vmatprep.subr.bf16.mxu1 %v2493_v11  ;;  %v2579_v10 = vcombine.high %v499_v0, %v503_v1 }
 0x17f   : > { %2028 = vmatpush1.bf16.xpose.msra.mxu0 %v2490_v17  ;;  %2069 = vmatpush1.bf16.xpose.msra.mxu1 %v2492_v18  ;;  %v496_v17 = vld [vmem:[%s3023_s11 + $0x728] sm:$0xff]  ;;  %v2578_v18 = vcombine.low %v499_v0, %v503_v1  ;;  %v454_v0 = vld [vmem:[%s3023_s11 + $0x5d8] sm:$0xff] }
 0x180   : > { %2029 = vmatprep.subr.bf16.mxu0 %v2483_v21  ;;  %2070 = vmatprep.subr.bf16.mxu1 %v2485_v23  ;;  %v2580_v21 = vcombine.low %v500_v3, %v504_v4  ;;  %v2571_v23 = vcombine.high %v491_v13, %v495_v14  ;;  %v2573_v24 = vcombine.high %v492_v15, %v496_v17  ;;  %v458_v1 = vld [vmem:[%s3023_s11 + $0x5f8] sm:$0xff] }
 0x187   : > { %2030 = vmatpush1.bf16.xpose.msra.mxu0 %v2482_v28  ;;  %2071 = vmatpush1.bf16.xpose.msra.mxu1 %v2484_v29  ;;  %v488_v28 = vld [vmem:[%s3023_s11 + $0x6e8] sm:$0xff]  ;;  %v2570_v29 = vcombine.low %v491_v13, %v495_v14 }
 0x188   : > { %2031 = vmatprep.subr.bf16.mxu0 %v2475_v32  ;;  %2072 = vmatprep.subr.bf16.mxu1 %v2477_v33  ;;  %v2572_v32 = vcombine.low %v492_v15, %v496_v17  ;;  %v2563_v33 = vcombine.high %v483_v25, %v487_v31  ;;  %v2565_v35 = vcombine.high %v484_v27, %v488_v28  ;;  %v437_v15 = vld [vmem:[%s3023_s11 + $0x550] sm:$0xff] }
 0x189   : > { %v441_v17 = vld [vmem:[%s3023_s11 + $0x570] sm:$0xff] }
 0x18f   : > { %2032 = vmatpush1.bf16.xpose.msra.mxu0 %v2474_v42  ;;  %2073 = vmatpush1.bf16.xpose.msra.mxu1 %v2476_v45  ;;  %v2562_v42 = vcombine.low %v483_v25, %v487_v31  ;;  %v2564_v45 = vcombine.low %v484_v27, %v488_v28  ;;  %v429_v25 = vld [vmem:[%s3023_s11 + $0x510] sm:$0xff]  ;;  %v430_v27 = vld [vmem:[%s3023_s11 + $0x518] sm:$0xff]  ;;  %v2518_v28 = vcombine.low %v437_v15, %v441_v17 }
 0x190   : > { %2033 = vmatprep.subr.bf16.mxu0 %v2595_v46  ;;  %2074 = vmatprep.subr.bf16.mxu1 %v2597_v47  ;;  %v2555_v46 = vcombine.high %v475_v36, %v479_v38  ;;  %v2557_v47 = vcombine.high %v476_v39, %v480_v41  ;;  %v433_v31 = vld [vmem:[%s3023_s11 + $0x530] sm:$0xff]  ;;  %v422_v36 = vld [vmem:[%s3023_s11 + $0x4d8] sm:$0xff] }
 0x191   : > { %v426_v38 = vld [vmem:[%s3023_s11 + $0x4f8] sm:$0xff]  ;;  %v2510_v39 = vcombine.low %v429_v25, %v433_v31 }
 0x196   : > { %v1887_v58 = vpop.f32.mrf.mxu0  ;;  %v1928_v37 = vpop.f32.mrf.mxu1 }
 0x197   : > { %v1888_v59 = vadd.f32 %v1887_v58, %v528_v53  ;;  %2034 = vmatpush2.bf16.xpose.msra.mxu0 %v2594_v54  ;;  %2075 = vmatpush2.bf16.xpose.msra.mxu1 %v2596_v55  ;;  %v2547_v53 = vcombine.high %v467_v19, %v471_v22  ;;  %v2549_v54 = vcombine.high %v468_v49, %v472_v50  ;;  %v459_v55 = vld [vmem:[%s3023_s11 + $0x600] sm:$0xff] }
 0x198   : > { %v1889_v60 = vpop.f32.mrf.mxu0  ;;  %2035 = vmatprep.subr.bf16.mxu0 %v2587_v56  ;;  %v1930_v63 = vpop.f32.mrf.mxu1  ;;  %2076 = vmatprep.subr.bf16.mxu1 %v2589_v57  ;;  %v463_v56 = vld [vmem:[%s3023_s11 + $0x620] sm:$0xff]  ;;  %v464_v57 = vld [vmem:[%s3023_s11 + $0x628] sm:$0xff]  ;;  %v2546_v58 = vcombine.low %v467_v19, %v471_v22  ;;  %v414_v19 = vld [vmem:[%s3023_s11 + $0x498] sm:$0xff] }
 0x199   : > { %v3256_v61 = vadd.f32 %v1928_v37, %v1888_v59  ;;  %v1890_v62 = vadd.f32 %v1889_v60, %v532_v34  ;;  %v460_v34 = vld [vmem:[%s3023_s11 + $0x608] sm:$0xff]  ;;  %v2548_v59 = vcombine.low %v468_v49, %v472_v50  ;;  %v2539_v37 = vcombine.high %v459_v55, %v463_v56  ;;  %v418_v22 = vld [vmem:[%s3023_s11 + $0x4b8] sm:$0xff] }
 0x19a   : > { %v1891_v2 = vpop.f32.mrf.mxu0  ;;  %v1932_v6 = vpop.f32.mrf.mxu1  ;;  %v2541_v60 = vcombine.high %v460_v34, %v464_v57  ;;  %v2540_v3 = vcombine.low %v460_v34, %v464_v57  ;;  %v2504_v50 = vcombine.low %v422_v36, %v426_v38  ;;  %v2496_v57 = vcombine.low %v414_v19, %v418_v22 }
 0x19b   : > { %v3262_v5 = vadd.f32 %v1930_v63, %v1890_v62  ;;  %v453_v62 = vld [vmem:[%s3023_s11 + $0x5d0] sm:$0xff]  ;;  %v2538_v2 = vcombine.low %v459_v55, %v463_v56  ;;  %v2537_v6 = vcombine.high %v454_v0, %v458_v1  ;;  %v406_v55 = vld [vmem:[%s3023_s11 + $0x458] sm:$0xff] }
 0x19c   : > { %v1892_v8 = vpop.f32.mrf.mxu0  ;;  %v1933_v11 = vpop.f32.mrf.mxu1  ;;  %v457_v63 = vld [vmem:[%s3023_s11 + $0x5f0] sm:$0xff]  ;;  %v410_v56 = vld [vmem:[%s3023_s11 + $0x478] sm:$0xff] }
 0x19d   : > { %v2535_v4 = vcombine.high %v453_v62, %v457_v63  ;;  %v449_v8 = vld [vmem:[%s3023_s11 + $0x5b0] sm:$0xff]  ;;  %v2534_v11 = vcombine.low %v453_v62, %v457_v63  ;;  %v398_v62 = vld [vmem:[%s3023_s11 + $0x418] sm:$0xff] }
 0x19e   : > { %v402_v63 = vld [vmem:[%s3023_s11 + $0x438] sm:$0xff] }
 0x19f   : > { %2036 = vmatpush2.bf16.xpose.msra.mxu0 %v2586_v7  ;;  %2077 = vmatpush2.bf16.xpose.msra.mxu1 %v2588_v9  ;;  %v445_v7 = vld [vmem:[%s3023_s11 + $0x590] sm:$0xff]  ;;  %v446_v9 = vld [vmem:[%s3023_s11 + $0x598] sm:$0xff] }
 0x1a0   : > { %2037 = vmatprep.subr.bf16.mxu0 %v2579_v10  ;;  %2078 = vmatprep.subr.bf16.mxu1 %v2581_v12  ;;  %v450_v10 = vld [vmem:[%s3023_s11 + $0x5b8] sm:$0xff]  ;;  %v2536_v12 = vcombine.low %v454_v0, %v458_v1  ;;  %v2527_v13 = vcombine.high %v445_v7, %v449_v8  ;;  %v2488_v1 = vcombine.low %v406_v55, %v410_v56 }
 0x1a1   : > { %v2529_v14 = vcombine.high %v446_v9, %v450_v10 }
 0x1a7   : > { %2038 = vmatpush2.bf16.xpose.msra.mxu0 %v2578_v18  ;;  %2079 = vmatpush2.bf16.xpose.msra.mxu1 %v2580_v21  ;;  %v438_v18 = vld [vmem:[%s3023_s11 + $0x558] sm:$0xff] }
 0x1a8   : > { %2039 = vmatprep.subr.bf16.mxu0 %v2571_v23  ;;  %2080 = vmatprep.subr.bf16.mxu1 %v2573_v24  ;;  %v442_v21 = vld [vmem:[%s3023_s11 + $0x578] sm:$0xff]  ;;  %v2526_v23 = vcombine.low %v445_v7, %v449_v8  ;;  %v2519_v24 = vcombine.high %v437_v15, %v441_v17 }
 0x1a9   : > { %v518_v7 = vld [vmem:[%s3023_s11 + $0x7d8] sm:$0xff] }
 0x1aa   : > { %v522_v8 = vld [vmem:[%s3023_s11 + $0x7f8] sm:$0xff] }
 0x1ab   : > { %v510_v15 = vld [vmem:[%s3023_s11 + $0x798] sm:$0xff] }
 0x1ac   : > { %v514_v17 = vld [vmem:[%s3023_s11 + $0x7b8] sm:$0xff] }
 0x1af   : > { %2040 = vmatpush2.bf16.xpose.msra.mxu0 %v2570_v29  ;;  %2081 = vmatpush2.bf16.xpose.msra.mxu1 %v2572_v32  ;;  %v2520_v29 = vcombine.low %v438_v18, %v442_v21  ;;  %v2511_v32 = vcombine.high %v429_v25, %v433_v31 }
 0x1b0   : > { %2041 = vmatprep.subr.bf16.mxu0 %v2563_v33  ;;  %2082 = vmatprep.subr.bf16.mxu1 %v2565_v35  ;;  %v421_v33 = vld [vmem:[%s3023_s11 + $0x4d0] sm:$0xff] }
 0x1b1   : > { %v425_v35 = vld [vmem:[%s3023_s11 + $0x4f0] sm:$0xff] }
 0x1b2   : > { %v2502_v49 = vcombine.low %v421_v33, %v425_v35 }
 0x1b7   : > { %2042 = vmatpush2.bf16.xpose.msra.mxu0 %v2562_v42  ;;  %2083 = vmatpush2.bf16.xpose.msra.mxu1 %v2564_v45  ;;  %v2503_v42 = vcombine.high %v421_v33, %v425_v35  ;;  %v2505_v45 = vcombine.high %v422_v36, %v426_v38  ;;  %v502_v33 = vld [vmem:[%s3023_s11 + $0x758] sm:$0xff] }
 0x1b8   : > { %2043 = vmatprep.subr.bf16.mxu0 %v2555_v46  ;;  %2084 = vmatprep.subr.bf16.mxu1 %v2557_v47  ;;  %v413_v46 = vld [vmem:[%s3023_s11 + $0x490] sm:$0xff]  ;;  %v506_v35 = vld [vmem:[%s3023_s11 + $0x778] sm:$0xff] }
 0x1b9   : > { %v417_v47 = vld [vmem:[%s3023_s11 + $0x4b0] sm:$0xff] }
 0x1ba   : > { %v2494_v34 = vcombine.low %v413_v46, %v417_v47 }
 0x1bf   : > { %2044 = vmatpush2.bf16.xpose.msra.mxu0 %v2554_v51  ;;  %2085 = vmatpush2.bf16.xpose.msra.mxu1 %v2556_v52  ;;  %v2495_v51 = vcombine.high %v413_v46, %v417_v47  ;;  %v2497_v52 = vcombine.high %v414_v19, %v418_v22  ;;  %v2585_v47 = vcombine.high %v502_v33, %v506_v35  ;;  %v493_v19 = vld [vmem:[%s3023_s11 + $0x710] sm:$0xff] }
 0x1c0   : > { %2045 = vmatprep.subr.bf16.mxu0 %v2547_v53  ;;  %2086 = vmatprep.subr.bf16.mxu1 %v2549_v54  ;;  %v405_v53 = vld [vmem:[%s3023_s11 + $0x450] sm:$0xff] }
 0x1c1   : > { %v409_v54 = vld [vmem:[%s3023_s11 + $0x470] sm:$0xff] }
 0x1c2   : > { %v2486_v0 = vcombine.low %v405_v53, %v409_v54  ;;  %v497_v22 = vld [vmem:[%s3023_s11 + $0x730] sm:$0xff] }
 0x1c7   : > { %2046 = vmatpush2.bf16.xpose.msra.mxu0 %v2546_v58  ;;  %2087 = vmatpush2.bf16.xpose.msra.mxu1 %v2548_v59  ;;  %v2487_v58 = vcombine.high %v405_v53, %v409_v54  ;;  %v2489_v59 = vcombine.high %v406_v55, %v410_v56  ;;  %v2575_v53 = vcombine.high %v493_v19, %v497_v22  ;;  %v485_v55 = vld [vmem:[%s3023_s11 + $0x6d0] sm:$0xff] }
 0x1c8   : > { %2047 = vmatprep.subr.bf16.mxu0 %v2539_v37  ;;  %2088 = vmatprep.subr.bf16.mxu1 %v2541_v60  ;;  %v397_v37 = vld [vmem:[%s3023_s11 + $0x410] sm:$0xff] }
 0x1c9   : > { %v401_v60 = vld [vmem:[%s3023_s11 + $0x430] sm:$0xff] }
 0x1ca   : > { %v489_v56 = vld [vmem:[%s3023_s11 + $0x6f0] sm:$0xff] }
 0x1cf   : > { %2048 = vmatpush2.bf16.xpose.msra.mxu0 %v2538_v2  ;;  %2089 = vmatpush2.bf16.xpose.msra.mxu1 %v2540_v3  ;;  %v2479_v2 = vcombine.high %v397_v37, %v401_v60  ;;  %v2481_v3 = vcombine.high %v398_v62, %v402_v63 }
 0x1d0   : > { %2099 = vmatprep.subr.bf16.mxu0 %v2535_v4  ;;  %2140 = vmatprep.subr.bf16.mxu1 %v2537_v6  ;;  %v517_v4 = vld [vmem:[%s3023_s11 + $0x7d0] sm:$0xff] }
 0x1d1   : > { %v521_v6 = vld [vmem:[%s3023_s11 + $0x7f0] sm:$0xff] }
 0x1d6   : > { %2050 = vmatmul.mubr.bf16.vlgmr.msra.gmra.mxu0 %v3115_v16  ;;  %2091 = vmatmul.mubr.bf16.vlgmr.msra.gmra.mxu1 %v3123_v20  ;;  %v2528_v16 = vcombine.low %v446_v9, %v450_v10  ;;  %v2521_v20 = vcombine.high %v438_v18, %v442_v21  ;;  %v2478_v9 = vcombine.low %v397_v37, %v401_v60 }
 0x1d7   : > { %2100 = vmatpush1.bf16.xpose.msra.mxu0 %v2534_v11  ;;  %2141 = vmatpush1.bf16.xpose.msra.mxu1 %v2536_v12  ;;  %v2480_v10 = vcombine.low %v398_v62, %v402_v63  ;;  %v2599_v11 = vcombine.high %v517_v4, %v521_v6  ;;  %v2601_v12 = vcombine.high %v518_v7, %v522_v8  ;;  %v477_v62 = vld [vmem:[%s3023_s11 + $0x690] sm:$0xff] }
 0x1d8   : > { %2101 = vmatprep.subr.bf16.mxu0 %v2527_v13  ;;  %2142 = vmatprep.subr.bf16.mxu1 %v2529_v14  ;;  %v509_v13 = vld [vmem:[%s3023_s11 + $0x790] sm:$0xff]  ;;  %v2598_v18 = vcombine.low %v517_v4, %v521_v6  ;;  %v2600_v21 = vcombine.low %v518_v7, %v522_v8  ;;  %v2567_v37 = vcombine.high %v485_v55, %v489_v56 }
 0x1d9   : > { %2131 = vmatprep.mubr.bf16.mxu0 %v3129_v30  ;;  %2172 = vmatprep.mubr.bf16.mxu1 %v3134_v26  ;;  %v434_v30 = vld [vmem:[%s3023_s11 + $0x538] sm:$0xff]  ;;  %v513_v14 = vld [vmem:[%s3023_s11 + $0x7b0] sm:$0xff] }
 0x1da   : > { %v2513_v26 = vcombine.high %v430_v27, %v434_v30  ;;  %v2512_v41 = vcombine.low %v430_v27, %v434_v30  ;;  %v481_v63 = vld [vmem:[%s3023_s11 + $0x6b0] sm:$0xff] }
 0x1db   : > { %v2559_v4 = vcombine.high %v477_v62, %v481_v63  ;;  %v469_v7 = vld [vmem:[%s3023_s11 + $0x650] sm:$0xff] }
 0x1dc   : > { %v473_v8 = vld [vmem:[%s3023_s11 + $0x670] sm:$0xff] }
 0x1df   : > { %2102 = vmatpush1.bf16.xpose.msra.mxu0 %v2526_v23  ;;  %2143 = vmatpush1.bf16.xpose.msra.mxu1 %v2528_v16  ;;  %v2591_v23 = vcombine.high %v509_v13, %v513_v14  ;;  %v2593_v16 = vcombine.high %v510_v15, %v514_v17 }
 0x1e0   : > { %2103 = vmatprep.subr.bf16.mxu0 %v2519_v24  ;;  %2144 = vmatprep.subr.bf16.mxu1 %v2521_v20 }
 0x1e7   : > { %2104 = vmatpush1.bf16.xpose.msra.mxu0 %v2518_v28  ;;  %2145 = vmatpush1.bf16.xpose.msra.mxu1 %v2520_v29  ;;  %v501_v29 = vld [vmem:[%s3023_s11 + $0x750] sm:$0xff] }
 0x1e8   : > { %2105 = vmatprep.subr.bf16.mxu0 %v2511_v32  ;;  %2146 = vmatprep.subr.bf16.mxu1 %v2513_v26  ;;  %v505_v32 = vld [vmem:[%s3023_s11 + $0x770] sm:$0xff] }
 0x1ef   : > { %2106 = vmatpush1.bf16.xpose.msra.mxu0 %v2510_v39  ;;  %2147 = vmatpush1.bf16.xpose.msra.mxu1 %v2512_v41  ;;  %v2590_v39 = vcombine.low %v509_v13, %v513_v14  ;;  %v2551_v13 = vcombine.high %v469_v7, %v473_v8 }
 0x1f0   : > { %2107 = vmatprep.subr.bf16.mxu0 %v2503_v42  ;;  %2148 = vmatprep.subr.bf16.mxu1 %v2505_v45  ;;  %v2592_v42 = vcombine.low %v510_v15, %v514_v17  ;;  %v2583_v45 = vcombine.high %v501_v29, %v505_v32  ;;  %v461_v15 = vld [vmem:[%s3023_s11 + $0x610] sm:$0xff] }
 0x1f1   : > { %v465_v17 = vld [vmem:[%s3023_s11 + $0x630] sm:$0xff] }
 0x1f7   : > { %2108 = vmatpush1.bf16.xpose.msra.mxu0 %v2502_v49  ;;  %2149 = vmatpush1.bf16.xpose.msra.mxu1 %v2504_v50  ;;  %v494_v49 = vld [vmem:[%s3023_s11 + $0x718] sm:$0xff] }
 0x1f8   : > { %2109 = vmatprep.subr.bf16.mxu0 %v2495_v51  ;;  %2150 = vmatprep.subr.bf16.mxu1 %v2497_v52  ;;  %v498_v50 = vld [vmem:[%s3023_s11 + $0x738] sm:$0xff]  ;;  %v2582_v51 = vcombine.low %v501_v29, %v505_v32  ;;  %v2584_v52 = vcombine.low %v502_v33, %v506_v35 }
 0x1f9   : > { %v2577_v54 = vcombine.high %v494_v49, %v498_v50 }
 0x1ff   : > { %2110 = vmatpush1.bf16.xpose.msra.mxu0 %v2494_v34  ;;  %2151 = vmatpush1.bf16.xpose.msra.mxu1 %v2496_v57  ;;  %v486_v34 = vld [vmem:[%s3023_s11 + $0x6d8] sm:$0xff] }
 0x200   : > { %2111 = vmatprep.subr.bf16.mxu0 %v2487_v58  ;;  %2152 = vmatprep.subr.bf16.mxu1 %v2489_v59  ;;  %v490_v57 = vld [vmem:[%s3023_s11 + $0x6f8] sm:$0xff]  ;;  %v2574_v58 = vcombine.low %v493_v19, %v497_v22  ;;  %v2576_v59 = vcombine.low %v494_v49, %v498_v50 }
 0x201   : > { %v2569_v60 = vcombine.high %v486_v34, %v490_v57 }
 0x207   : > { %2112 = vmatpush1.bf16.xpose.msra.mxu0 %v2486_v0  ;;  %2153 = vmatpush1.bf16.xpose.msra.mxu1 %v2488_v1  ;;  %v478_v0 = vld [vmem:[%s3023_s11 + $0x698] sm:$0xff] }
 0x208   : > { %2113 = vmatprep.subr.bf16.mxu0 %v2479_v2  ;;  %2154 = vmatprep.subr.bf16.mxu1 %v2481_v3  ;;  %v482_v1 = vld [vmem:[%s3023_s11 + $0x6b8] sm:$0xff]  ;;  %v2566_v2 = vcombine.low %v485_v55, %v489_v56  ;;  %v2568_v3 = vcombine.low %v486_v34, %v490_v57 }
 0x209   : > { %v2561_v6 = vcombine.high %v478_v0, %v482_v1 }
 0x20f   : > { %2114 = vmatpush1.bf16.xpose.msra.mxu0 %v2478_v9  ;;  %2155 = vmatpush1.bf16.xpose.msra.mxu1 %v2480_v10  ;;  %v470_v9 = vld [vmem:[%s3023_s11 + $0x658] sm:$0xff] }
 0x210   : > { %2115 = vmatprep.subr.bf16.mxu0 %v2599_v11  ;;  %2156 = vmatprep.subr.bf16.mxu1 %v2601_v12  ;;  %v474_v10 = vld [vmem:[%s3023_s11 + $0x678] sm:$0xff]  ;;  %v2558_v11 = vcombine.low %v477_v62, %v481_v63  ;;  %v2560_v12 = vcombine.low %v478_v0, %v482_v1 }
 0x211   : > { %v2553_v14 = vcombine.high %v470_v9, %v474_v10 }
 0x216   : > { %v1969_v24 = vpop.f32.mrf.mxu0  ;;  %v2010_v25 = vpop.f32.mrf.mxu1 }
 0x217   : > { %v1970_v20 = vadd.f32 %v1969_v24, %v3256_v61  ;;  %2116 = vmatpush2.bf16.xpose.msra.mxu0 %v2598_v18  ;;  %2157 = vmatpush2.bf16.xpose.msra.mxu1 %v2600_v21  ;;  %v462_v18 = vld [vmem:[%s3023_s11 + $0x618] sm:$0xff]  ;;  %v2543_v24 = vcombine.high %v461_v15, %v465_v17 }
 0x218   : > { %v1971_v31 = vpop.f32.mrf.mxu0  ;;  %2117 = vmatprep.subr.bf16.mxu0 %v2591_v23  ;;  %v2012_v28 = vpop.f32.mrf.mxu1  ;;  %2158 = vmatprep.subr.bf16.mxu1 %v2593_v16  ;;  %v466_v21 = vld [vmem:[%s3023_s11 + $0x638] sm:$0xff]  ;;  %v2550_v23 = vcombine.low %v469_v7, %v473_v8  ;;  %v2552_v16 = vcombine.low %v470_v9, %v474_v10 }
 0x219   : > { %v2011_v27 = vadd.f32 %v2010_v25, %v1970_v20  ;;  %v1972_v30 = vadd.f32 %v1971_v31, %v3262_v5  ;;  %v2545_v20 = vcombine.high %v462_v18, %v466_v21  ;;  %v2542_v25 = vcombine.low %v461_v15, %v465_v17 }
 0x21a   : > { %v1973_v26 = vpop.f32.mrf.mxu0  ;;  %v2014_v61 = vpop.f32.mrf.mxu1  ;;  %v2544_v31 = vcombine.low %v462_v18, %v466_v21 }
 0x21b   : > { %v2181_v36 = vmax.f32 %v2011_v27, 0.0  ;;  %v2013_v38 = vadd.f32 %v2012_v28, %v1972_v30  ;;  %v535_v27 = vsub.s32 2, %v3244_v44  ;;  %v539_v30 = vsub.s32 3, %v3244_v44 }
 0x21c   : > { %v1974_v41 = vpop.f32.mrf.mxu0  ;;  %v2015_v46 = vpop.f32.mrf.mxu1 }
 0x21d   : > { %2185 = vst [vmem:[%s3335_s26] sm:$0xff] %v2181_v36  ;;  %v2182_v5 = vmax.f32 %v2013_v38, 0.0  ;;  %v536_v28 = vrot.slane %v3247_v48, %v535_v27  ;;  %v540_v29 = vrot.slane %v3247_v48, %v539_v30 }
 0x21f   : > { %2186 = vst [vmem:[%s3335_s26 + $0x8] sm:$0xff] %v2182_v5  ;;  %2118 = vmatpush2.bf16.xpose.msra.mxu0 %v2590_v39  ;;  %2159 = vmatpush2.bf16.xpose.msra.mxu1 %v2592_v42 }
 0x220   : > { %2119 = vmatprep.subr.bf16.mxu0 %v2583_v45  ;;  %2160 = vmatprep.subr.bf16.mxu1 %v2585_v47 }
 0x227   : > { %2120 = vmatpush2.bf16.xpose.msra.mxu0 %v2582_v51  ;;  %2161 = vmatpush2.bf16.xpose.msra.mxu1 %v2584_v52 }
 0x228   : > { %2121 = vmatprep.subr.bf16.mxu0 %v2575_v53  ;;  %2162 = vmatprep.subr.bf16.mxu1 %v2577_v54 }
 0x22f   : > { %2122 = vmatpush2.bf16.xpose.msra.mxu0 %v2574_v58  ;;  %2163 = vmatpush2.bf16.xpose.msra.mxu1 %v2576_v59 }
 0x230   : > { %2123 = vmatprep.subr.bf16.mxu0 %v2567_v37  ;;  %2164 = vmatprep.subr.bf16.mxu1 %v2569_v60 }
 0x237   : > { %2124 = vmatpush2.bf16.xpose.msra.mxu0 %v2566_v2  ;;  %2165 = vmatpush2.bf16.xpose.msra.mxu1 %v2568_v3 }
 0x238   : > { %2125 = vmatprep.subr.bf16.mxu0 %v2559_v4  ;;  %2166 = vmatprep.subr.bf16.mxu1 %v2561_v6 }
 0x23f   : > { %2126 = vmatpush2.bf16.xpose.msra.mxu0 %v2558_v11  ;;  %2167 = vmatpush2.bf16.xpose.msra.mxu1 %v2560_v12 }
 0x240   : > { %2127 = vmatprep.subr.bf16.mxu0 %v2551_v13  ;;  %2168 = vmatprep.subr.bf16.mxu1 %v2553_v14 }
 0x247   : > { %2128 = vmatpush2.bf16.xpose.msra.mxu0 %v2550_v23  ;;  %2169 = vmatpush2.bf16.xpose.msra.mxu1 %v2552_v16 }
 0x248   : > { %2129 = vmatprep.subr.bf16.mxu0 %v2543_v24  ;;  %2170 = vmatprep.subr.bf16.mxu1 %v2545_v20 }
 0x24f   : > { %2130 = vmatpush2.bf16.xpose.msra.mxu0 %v2542_v25  ;;  %2171 = vmatpush2.bf16.xpose.msra.mxu1 %v2544_v31 }
 0x256   : > { %2132 = vmatmul.mubr.bf16.vlgmr.msra.gmra.mxu0 %v3203_v40  ;;  %2173 = vmatmul.mubr.bf16.vlgmr.msra.gmra.mxu1 %v3209_v43 }
 0x296   : > { %v2051_v32 = vpop.f32.mrf.mxu0  ;;  %v2092_v33 = vpop.f32.mrf.mxu1 }
 0x297   : > { %v2052_v26 = vadd.f32 %v2051_v32, %v536_v28 }
 0x298   : > { %v2053_v35 = vpop.f32.mrf.mxu0  ;;  %v2094_v61 = vpop.f32.mrf.mxu1 }
 0x299   : > { %v2093_v36 = vadd.f32 %v2092_v33, %v2052_v26  ;;  %v2054_v38 = vadd.f32 %v2053_v35, %v540_v29 }
 0x29a   : > { %v2055_v40 = vpop.f32.mrf.mxu0  ;;  %v2096_v43 = vpop.f32.mrf.mxu1 }
 0x29b   : > { %v2095_v39 = vadd.f32 %v2094_v61, %v2054_v38 }
 0x29c   : > { %v2056_v41 = vpop.f32.mrf.mxu0  ;;  %v2097_v42 = vpop.f32.mrf.mxu1 }
 0x316   : > { %v2133_v44 = vpop.f32.mrf.mxu0  ;;  %v2174_v5 = vpop.f32.mrf.mxu1 }
 0x317   : > { %v2134_v45 = vadd.f32 %v2133_v44, %v2093_v36 }
 0x318   : > { %v2135_v46 = vpop.f32.mrf.mxu0  ;;  %v2176_v19 = vpop.f32.mrf.mxu1 }
 0x319   : > { %v2175_v48 = vadd.f32 %v2174_v5, %v2134_v45  ;;  %v2136_v47 = vadd.f32 %v2135_v46, %v2095_v39 }
 0x31a   : > { %v2137_v22 = vpop.f32.mrf.mxu0  ;;  %v2178_v51 = vpop.f32.mrf.mxu1 }
 0x31b   : > { %v2183_v49 = vmax.f32 %v2175_v48, 0.0  ;;  %v2177_v50 = vadd.f32 %v2176_v19, %v2136_v47 }
 0x31c   : > { %v2138_v52 = vpop.f32.mrf.mxu0  ;;  %v2179_v54 = vpop.f32.mrf.mxu1 }
 0x31d   : > { %2187 = vst [vmem:[%s3335_s26 + $0x10] sm:$0xff] %v2183_v49  ;;  %v2184_v53 = vmax.f32 %v2177_v50, 0.0 }
 0x31f   : > { %2188 = vst [vmem:[%s3335_s26 + $0x18] sm:$0xff] %v2184_v53 }
 0x320   : > { %2794 = shalt.err (!%p2791_p6)
}
 0x321   : > { %s2795_s9 = scalar_lea.hbm %s2204_s27, 512  ;;  %s2799_s11 = scalar_lea.hbm %s3411_s3, 1024 }
 0x322   : > { %p2796_p8 = scmp.ne.s32.totalorder %s2204_s27, %s2795_s9  ;;  %p2800_p1 = scmp.lt.s32.totalorder %s2204_s27, %s3411_s3 }
 0x323   : > { %p2801_p5 = scmp.lt.s32.totalorder %s2799_s11, %s2795_s9 }
 0x324   : > { %p2797_p13 = pnand %p2796_p8, %p3427_p2 }
 0x325   : > { %p2802_p7 = por %p2801_p5, %p2800_p1 }
 0x326   : > { %p2798_p12 = pneg %p2797_p13 }
 0x328   : > { %p2803_p11 = pnand %p2802_p7, %p2798_p12 }
 0x32a   : > { %2806 = shalt.err (!%p2803_p11)
}
 0x32b   : > { %2619 = dma.vmem_to_hbm [thread:$0]  (%p3427_p2), %s2207_s10, 512, %s2204_s27, %s2190_s30  }
 0x32c PF: > { %s2218_s21 = sand.u32 1, %s2845_s12   ;;  %p3428_p9 = scmp.ne.s32.totalorder %s3420_s25, 0 }
 0x32d   : > { %p3429_p10 = scmp.ge.s32.totalorder %s2865_s17, 2  ;;  %s2219_s26 = scalar_lea.sflag [#allocation4], %s2218_s21 }
 0x32f   : > { %p2633_p0 = pnand %p3429_p10, %p3428_p9 }
 0x331   : > { %p2634_p3 = pneg %p2633_p0 }
 0x333   : > { %2840 = dma.done.wait (%p2634_p3), %s2219_s26, 512  }
 0x334   : > { %2842 = vsyncadd (%p2634_p3), %s2219_s26, 4294966784  ;;  %s20_s17 = sadd.s32 1, %s2865_s17   ;;  %s3430_s12 = smov %s2849_s13 }
 0x335   : > { %p17_p4 = scmp.ge.s32.totalorder %s20_s17, 4   ;;  %s3431_s13 = smov %s2853_s14 }
 0x336   : > { %s3432_s14 = smov %s2941_s24  ;;  %s3433_s15 = smov %s2861_s16 }
 0x337   : > { %s3434_s16 = smov %s3436_s18  ;;  %19 = sbr.rel (!%p17_p4) target bundleno = 7 (0x7), region = 94 }
 0x33c   :  { %2224 = vsyncpa [#allocation3], 1 }
 0x33d   :  { %2226 = vsyncpa [#allocation3 + $0x1], 1 }
 0x33e   :  { %2227 = vsyncpa [#allocation6], 1 }
 0x33f   :  { %2229 = vsyncpa [#allocation6 + $0x1], 1 }
 0x340   :  { %2230 = vsyncpa [#allocation4], 1 }
 0x341   :  { %2232 = vsyncpa [#allocation4 + $0x1], 1 }

</bundles_post_ra>
